<compile_context>
chip_gen: v7x
topology: tpu7x:2x2x1
jax: 0.10.0
libtpu: 0.0.40
codegen_flags: <defaults>
</compile_context>

<pallas_src>
import functools
import math

import jax
import jax.numpy as jnp
from jax import lax
from jax.experimental import pallas as pl
from jax.experimental.pallas import tpu as pltpu


def _dot(a, b):
    """MXU matmul, f32 accumulation (operands expected bf16)."""
    return jnp.dot(a, b, preferred_element_type=jnp.float32)


def _dot_nt(a, b):
    """a @ b.T via dot_general contracting the last dims (no XLU transpose)."""
    return lax.dot_general(a, b, dimension_numbers=(((1,), (1,)), ((), ())),
                           preferred_element_type=jnp.float32)


def fda_kernel(q_ref, k_ref, v_ref,
               wqp_ref, wkp_ref, wv_ref, wo_ref,
               bqp_ref, bkp_ref, bv_ref, bo_ref,
               out_ref,
               kp_scr, v_scr, acc_scr,
               *, num_heads, head_dim, seq_len, exp_dtype):
    S = seq_len
    Dh = head_dim
    bf16 = jnp.bfloat16

    # K/V-side projections depend only on the batch index.  The query-tile
    # grid axis is innermost ("arbitrary"), so refresh the caches at qi == 0.
    @pl.when(pl.program_id(1) == 0)
    def _():
        k = k_ref[0]                                               # (S, E) bf16
        v = v_ref[0]
        kp = (_dot(k, wkp_ref[...]) + bkp_ref[...]).astype(bf16)   # (S, 4E)
        two_e = kp.shape[-1] // 2
        kp_scr[0:S, :] = kp[:, :two_e]          # per-head [Kr | -Ki]
        kp_scr[S:2 * S, :] = kp[:, two_e:]      # per-head [Ki |  Kr]
        v_scr[...] = (_dot(v, wv_ref[...]) + bv_ref[...]).astype(bf16)

    # Query-side packed projection for this row tile: per-head [Qr | Qi].
    q = q_ref[0]                                                    # (TQ, E)
    qp = (_dot(q, wqp_ref[...]) + bqp_ref[...]).astype(bf16)        # (TQ, 2E)

    # Static loop over heads (small H here).
    # TODO(synk): grid-over-heads / grouped 128-lane head blocks once Dh >= 128.
    for h in range(num_heads):
        qh = qp[:, 2 * h * Dh:2 * (h + 1) * Dh]                     # (TQ, 2Dh)
        kh = kp_scr[:, 2 * h * Dh:2 * (h + 1) * Dh]                 # (2S, 2Dh)
        vh = v_scr[:, h * Dh:(h + 1) * Dh]                          # (S, Dh)

        # One wide-K matmul yields both real and imaginary score parts.
        s_all = _dot_nt(qh, kh)                                     # (TQ, 2S) f32
        sr = s_all[:, :S]
        si = s_all[:, S:]
        # 1/sqrt(Dh) already folded into the Q/K weights.
        scores = jnp.sqrt(sr * sr + si * si)

        # Numerically stable softmax over keys (exp in bf16 on v6e/v7x only).
        scores = scores - jnp.max(scores, axis=-1, keepdims=True)
        p = jnp.exp(scores.astype(exp_dtype))
        l = jnp.sum(p.astype(jnp.float32), axis=-1, keepdims=True)

        o = _dot(p.astype(bf16), vh)                                # (TQ, Dh) f32
        o = o * pl.reciprocal(l, approx=True)                       # normalize post-AV
        acc_scr[:, h * Dh:(h + 1) * Dh] = o.astype(bf16)

    # Output projection from the accumulated (TQ, E) attention output.
    out = _dot(acc_scr[...], wo_ref[...]) + bo_ref[...]
    # TODO(synk): emit bf16 output if downstream allows (halves HBM writeback
    # on v5e); kept f32 to match the PyTorch module.
    out_ref[0] = out.astype(out_ref.dtype)


def _interleave_heads(a, b, num_heads, head_dim):
    """Per-head column interleave: head h gets columns [a_h | b_h]."""
    lead = a.shape[:-1]
    ah = a.reshape(*lead, num_heads, head_dim)
    bh = b.reshape(*lead, num_heads, head_dim)
    out = jnp.concatenate([ah, bh], axis=-1)
    return out.reshape(*lead, num_heads * 2 * head_dim)


def _fold_weights(params, num_heads, head_dim):
    """Pre-transpose Linear weights; fold DFT + score scale; pack real/imag."""
    wq, bq, wk, bk, wv, bv, wo, bo = params
    Dh = head_dim
    H = num_heads

    # torch.fft.fft sign convention for real input: real = x @ C, imag = x @ Sm.
    n = jnp.arange(Dh, dtype=jnp.float32)
    ang = 2.0 * jnp.pi * jnp.outer(n, n) / Dh
    C = jnp.cos(ang)
    Sm = -jnp.sin(ang)
    eye_h = jnp.eye(H, dtype=jnp.float32)
    BDc = jnp.kron(eye_h, C)                       # (E, E) block-diag cos
    BDs = jnp.kron(eye_h, Sm)                      # (E, E) block-diag -sin

    s = float(Dh) ** -0.25                         # folded into both Q and K

    wq_r, bq_r = s * (wq.T @ BDc), s * (bq @ BDc)
    wq_i, bq_i = s * (wq.T @ BDs), s * (bq @ BDs)
    wk_r, bk_r = s * (wk.T @ BDc), s * (bk @ BDc)
    wk_i, bk_i = s * (wk.T @ BDs), s * (bk @ BDs)

    # Q pack: per-head [Qr | Qi]                                  -> (E, 2E)
    wq_pack = _interleave_heads(wq_r, wq_i, H, Dh)
    bq_pack = _interleave_heads(bq_r, bq_i, H, Dh)
    # K pack: [ per-head [Kr | -Ki] , per-head [Ki | Kr] ]        -> (E, 4E)
    wk_pack = jnp.concatenate(
        [_interleave_heads(wk_r, -wk_i, H, Dh),
         _interleave_heads(wk_i, wk_r, H, Dh)], axis=-1)
    bk_pack = jnp.concatenate(
        [_interleave_heads(bk_r, -bk_i, H, Dh),
         _interleave_heads(bk_i, bk_r, H, Dh)], axis=-1)

    bf16 = jnp.bfloat16
    weights = (wq_pack.astype(bf16), wk_pack.astype(bf16),
               wv.T.astype(bf16), wo.T.astype(bf16))
    biases = (bq_pack.reshape(1, -1).astype(jnp.float32),
              bk_pack.reshape(1, -1).astype(jnp.float32),
              bv.reshape(1, -1).astype(jnp.float32),
              bo.reshape(1, -1).astype(jnp.float32))
    return weights, biases


def _exp_dtype():
    # bf16 EUP exists on v6e/v7x only; keep exp in f32 on v5e and older.
    kind = jax.devices()[0].device_kind.lower()
    if any(tag in kind for tag in ("v6", "v7", "tpu7")):
        return jnp.bfloat16
    return jnp.float32


def _const_spec(shape):
    """BlockSpec for a grid-constant operand; single-buffered when supported."""
    index_map = lambda b, qi: (0,) * len(shape)
    try:
        # Constant index_map across the grid -> 1 buffer halves weight VMEM
        # (matters on v7x's 64 MiB VMEM).
        return pl.BlockSpec(shape, index_map, pipeline_mode=pl.Buffered(1))
    except Exception:  # older jax without pipeline_mode / Buffered
        return pl.BlockSpec(shape, index_map)


def frequency_domain_attention(query, key, value, params, num_heads,
                               q_tile=None):
    B, S, E = query.shape
    head_dim = E // num_heads

    if q_tile is None:
        q_tile = S if S <= 256 else 256
    assert S % q_tile == 0, (S, q_tile)
    num_q_tiles = S // q_tile

    weights, biases = _fold_weights(params, num_heads, head_dim)
    wq_pack, wk_pack, wv_t, wo_t = weights
    qb, kb, vb = (x.astype(jnp.bfloat16) for x in (query, key, value))

    q_spec = pl.BlockSpec((1, q_tile, E), lambda b, qi: (b, qi, 0))
    kv_spec = pl.BlockSpec((1, S, E), lambda b, qi: (b, 0, 0))
    out_spec = pl.BlockSpec((1, q_tile, E), lambda b, qi: (b, qi, 0))

    kernel = functools.partial(fda_kernel, num_heads=num_heads,
                               head_dim=head_dim, seq_len=S,
                               exp_dtype=_exp_dtype())

    return pl.pallas_call(
        kernel,
        out_shape=jax.ShapeDtypeStruct((B, S, E), jnp.float32),
        grid_spec=pltpu.PrefetchScalarGridSpec(
            num_scalar_prefetch=0,
            grid=(B, num_q_tiles),
            in_specs=[q_spec, kv_spec, kv_spec,
                      _const_spec(wq_pack.shape), _const_spec(wk_pack.shape),
                      _const_spec(wv_t.shape), _const_spec(wo_t.shape),
                      _const_spec(biases[0].shape), _const_spec(biases[1].shape),
                      _const_spec(biases[2].shape), _const_spec(biases[3].shape)],
            out_specs=out_spec,
            scratch_shapes=[
                pltpu.VMEM((2 * S, 2 * E), jnp.bfloat16),   # packed K real/imag
                pltpu.VMEM((S, E), jnp.bfloat16),           # projected V
                pltpu.VMEM((q_tile, E), jnp.bfloat16),      # attn-output acc
            ],
        ),
        compiler_params=pltpu.CompilerParams(
            # Batch is megacore-parallel; the query-tile axis stays "arbitrary"
            # because the K/V projection cache in scratch is refreshed at qi==0.
            dimension_semantics=("parallel", "arbitrary"),
            vmem_limit_bytes=32 * 1024 * 1024,
        ),
    )(qb, kb, vb, wq_pack, wk_pack, wv_t, wo_t, *biases)


def reference_jax(query, key, value, params, num_heads):
    """Pure-JAX reference mirroring the PyTorch forward (uses jnp.fft.fft)."""
    B, S, E = query.shape
    Dh = E // num_heads
    wq, bq, wk, bk, wv, bv, wo, bo = params

    def lin(x, w, b):
        return x @ w.T + b

    def split(x):
        return x.reshape(B, S, num_heads, Dh).transpose(0, 2, 1, 3)

    Q = split(lin(query, wq, bq))
    K = split(lin(key, wk, bk))
    V = split(lin(value, wv, bv))
    Qf = jnp.fft.fft(Q, axis=-1)
    Kf = jnp.fft.fft(K, axis=-1)
    scores = jnp.abs(jnp.einsum('bhqd,bhkd->bhqk', Qf, Kf)) / math.sqrt(Dh)
    attn = jax.nn.softmax(scores, axis=-1)
    out = jnp.einsum('bhqk,bhkd->bhqd', attn, V)
    out = out.transpose(0, 2, 1, 3).reshape(B, S, E)
    return lin(out, wo, bo)


if __name__ == "__main__":
    B, S, E, H = 2, 8, 32, 4

    key0 = jax.random.PRNGKey(0)
    ks = jax.random.split(key0, 12)
    bound = 1.0 / math.sqrt(E)

    def u(k, shape):
        return jax.random.uniform(k, shape, jnp.float32, -bound, bound)

    params = (
        u(ks[0], (E, E)), u(ks[1], (E,)),   # query_linear  (out,in), (out,)
        u(ks[2], (E, E)), u(ks[3], (E,)),   # key_linear
        u(ks[4], (E, E)), u(ks[5], (E,)),   # value_linear
        u(ks[6], (E, E)), u(ks[7], (E,)),   # out_linear
    )

    query = jax.random.normal(ks[8], (B, S, E), jnp.float32)
    key_in = jax.random.normal(ks[9], (B, S, E), jnp.float32)
    value = jax.random.normal(ks[10], (B, S, E), jnp.float32)

    out = frequency_domain_attention(query, key_in, value, params, H)
    out = jax.block_until_ready(out)

    ref = reference_jax(query, key_in, value, params, H)
    assert out.shape == (B, S, E)
    # bf16 MXU operands + approx reciprocal (+ bf16 exp on v6e/v7x) ->
    # loose-but-bug-catching bound vs the f32 reference.
    max_err = float(jnp.max(jnp.abs(out - ref)))
    assert max_err < 5e-2, max_err

    print("KERNEL_OK")
</pallas_src>

<mosaic_0001>
module attributes {stable_mosaic.version = 11 : i64} {
  func.func @fda_kernel(%arg0: i32, %arg1: i32, %arg2: memref<1x8x32xbf16, #tpu.memory_space<vmem>>, %arg3: memref<1x8x32xbf16, #tpu.memory_space<vmem>>, %arg4: memref<1x8x32xbf16, #tpu.memory_space<vmem>>, %arg5: memref<32x64xbf16, #tpu.memory_space<vmem>>, %arg6: memref<32x128xbf16, #tpu.memory_space<vmem>>, %arg7: memref<32x32xbf16, #tpu.memory_space<vmem>>, %arg8: memref<32x32xbf16, #tpu.memory_space<vmem>>, %arg9: memref<1x64xf32, #tpu.memory_space<vmem>>, %arg10: memref<1x128xf32, #tpu.memory_space<vmem>>, %arg11: memref<1x32xf32, #tpu.memory_space<vmem>>, %arg12: memref<1x32xf32, #tpu.memory_space<vmem>>, %arg13: memref<1x8x32xf32, #tpu.memory_space<vmem>>, %arg14: memref<16x64xbf16, #tpu.memory_space<vmem>>, %arg15: memref<8x32xbf16, #tpu.memory_space<vmem>>, %arg16: memref<8x32xbf16, #tpu.memory_space<vmem>>) attributes {dimension_semantics = [#tpu.dimension_semantics<parallel>, #tpu.dimension_semantics<arbitrary>], iteration_bounds = array<i64: 2, 1>, scalar_prefetch = 0 : i64, scratch_operands = 3 : i64, tpu.core_type = #tpu.core_type<tc>, window_params = [{transform_indices = @transform_0, window_bounds = array<i64: 1, 8, 32>}, {transform_indices = @transform_1, window_bounds = array<i64: 1, 8, 32>}, {transform_indices = @transform_2, window_bounds = array<i64: 1, 8, 32>}, {pipeline_mode = #tpu.pipeline_mode<synchronous>, transform_indices = @transform_3, window_bounds = array<i64: 32, 64>}, {pipeline_mode = #tpu.pipeline_mode<synchronous>, transform_indices = @transform_4, window_bounds = array<i64: 32, 128>}, {pipeline_mode = #tpu.pipeline_mode<synchronous>, transform_indices = @transform_5, window_bounds = array<i64: 32, 32>}, {pipeline_mode = #tpu.pipeline_mode<synchronous>, transform_indices = @transform_6, window_bounds = array<i64: 32, 32>}, {pipeline_mode = #tpu.pipeline_mode<synchronous>, transform_indices = @transform_7, window_bounds = array<i64: 1, 64>}, {pipeline_mode = #tpu.pipeline_mode<synchronous>, transform_indices = @transform_8, window_bounds = array<i64: 1, 128>}, {pipeline_mode = #tpu.pipeline_mode<synchronous>, transform_indices = @transform_9, window_bounds = array<i64: 1, 32>}, {pipeline_mode = #tpu.pipeline_mode<synchronous>, transform_indices = @transform_10, window_bounds = array<i64: 1, 32>}, {transform_indices = @transform_11, window_bounds = array<i64: 1, 8, 32>}]} {
    %c0_i32 = arith.constant 0 : i32
    %0 = arith.cmpi eq, %arg1, %c0_i32 : i32
    %1 = arith.extui %0 : i1 to i32
    %c0_i32_0 = arith.constant 0 : i32
    %2 = arith.cmpi ne, %1, %c0_i32_0 : i32
    scf.if %2 {
      %c0_52 = arith.constant 0 : index
      %c0_53 = arith.constant 0 : index
      %c0_54 = arith.constant 0 : index
      %116 = vector.load %arg3[%c0_52, %c0_53, %c0_54] : memref<1x8x32xbf16, #tpu.memory_space<vmem>>, vector<1x8x32xbf16>
      %117 = vector.shape_cast %116 : vector<1x8x32xbf16> to vector<8x32xbf16>
      %c0_55 = arith.constant 0 : index
      %c0_56 = arith.constant 0 : index
      %c0_57 = arith.constant 0 : index
      %118 = vector.load %arg4[%c0_55, %c0_56, %c0_57] : memref<1x8x32xbf16, #tpu.memory_space<vmem>>, vector<1x8x32xbf16>
      %119 = vector.shape_cast %118 : vector<1x8x32xbf16> to vector<8x32xbf16>
      %c0_58 = arith.constant 0 : index
      %c0_59 = arith.constant 0 : index
      %120 = vector.load %arg6[%c0_58, %c0_59] : memref<32x128xbf16, #tpu.memory_space<vmem>>, vector<32x128xbf16>
      %cst_60 = arith.constant dense<0.000000e+00> : vector<8x128xf32>
      %121 = tpu.matmul %117, %120, %cst_60 {dimension_numbers = #tpu.dot_dimension_numbers<[1], [0], [0], [1], [0, 0, 1, 1], [], []>} : vector<8x32xbf16>, vector<32x128xbf16>, vector<8x128xf32> -> vector<8x128xf32>
      %c0_61 = arith.constant 0 : index
      %c0_62 = arith.constant 0 : index
      %122 = vector.load %arg10[%c0_61, %c0_62] : memref<1x128xf32, #tpu.memory_space<vmem>>, vector<1x128xf32>
      %123 = vector.broadcast %122 : vector<1x128xf32> to vector<8x128xf32>
      %124 = arith.addf %121, %123 : vector<8x128xf32>
      %125 = arith.truncf %124 : vector<8x128xf32> to vector<8x128xbf16>
      %126 = vector.extract_strided_slice %125 {offsets = [0, 0], sizes = [8, 64], strides = [1, 1]} : vector<8x128xbf16> to vector<8x64xbf16>
      %c0_63 = arith.constant 0 : index
      %c0_64 = arith.constant 0 : index
      %127 = vector.load %arg14[%c0_63, %c0_64] : memref<16x64xbf16, #tpu.memory_space<vmem>>, vector<8x64xbf16>
      tpu.vector_store %arg14[%c0_63, %c0_64], %126 {strides = array<i32>} : memref<16x64xbf16, #tpu.memory_space<vmem>>, vector<8x64xbf16>,
      %128 = vector.extract_strided_slice %125 {offsets = [0, 64], sizes = [8, 64], strides = [1, 1]} : vector<8x128xbf16> to vector<8x64xbf16>
      %c8_65 = arith.constant 8 : index
      %c0_66 = arith.constant 0 : index
      %129 = vector.load %arg14[%c8_65, %c0_66] : memref<16x64xbf16, #tpu.memory_space<vmem>>, vector<8x64xbf16>
      tpu.vector_store %arg14[%c8_65, %c0_66], %128 {strides = array<i32>} : memref<16x64xbf16, #tpu.memory_space<vmem>>, vector<8x64xbf16>,
      %c0_67 = arith.constant 0 : index
      %c0_68 = arith.constant 0 : index
      %130 = vector.load %arg7[%c0_67, %c0_68] : memref<32x32xbf16, #tpu.memory_space<vmem>>, vector<32x32xbf16>
      %cst_69 = arith.constant dense<0.000000e+00> : vector<8x32xf32>
      %131 = tpu.matmul %119, %130, %cst_69 {dimension_numbers = #tpu.dot_dimension_numbers<[1], [0], [0], [1], [0, 0, 1, 1], [], []>} : vector<8x32xbf16>, vector<32x32xbf16>, vector<8x32xf32> -> vector<8x32xf32>
      %c0_70 = arith.constant 0 : index
      %c0_71 = arith.constant 0 : index
      %132 = vector.load %arg11[%c0_70, %c0_71] : memref<1x32xf32, #tpu.memory_space<vmem>>, vector<1x32xf32>
      %133 = vector.broadcast %132 : vector<1x32xf32> to vector<8x32xf32>
      %134 = arith.addf %131, %133 : vector<8x32xf32>
      %135 = arith.truncf %134 : vector<8x32xf32> to vector<8x32xbf16>
      %c0_72 = arith.constant 0 : index
      %c0_73 = arith.constant 0 : index
      %136 = vector.load %arg15[%c0_72, %c0_73] : memref<8x32xbf16, #tpu.memory_space<vmem>>, vector<8x32xbf16>
      tpu.vector_store %arg15[%c0_72, %c0_73], %135 {strides = array<i32>} : memref<8x32xbf16, #tpu.memory_space<vmem>>, vector<8x32xbf16>,
    } else {
    }
    %c0 = arith.constant 0 : index
    %c0_1 = arith.constant 0 : index
    %c0_2 = arith.constant 0 : index
    %3 = vector.load %arg2[%c0, %c0_1, %c0_2] : memref<1x8x32xbf16, #tpu.memory_space<vmem>>, vector<1x8x32xbf16>
    %4 = vector.shape_cast %3 : vector<1x8x32xbf16> to vector<8x32xbf16>
    %c0_3 = arith.constant 0 : index
    %c0_4 = arith.constant 0 : index
    %5 = vector.load %arg5[%c0_3, %c0_4] : memref<32x64xbf16, #tpu.memory_space<vmem>>, vector<32x64xbf16>
    %cst = arith.constant dense<0.000000e+00> : vector<8x64xf32>
    %6 = tpu.matmul %4, %5, %cst {dimension_numbers = #tpu.dot_dimension_numbers<[1], [0], [0], [1], [0, 0, 1, 1], [], []>} : vector<8x32xbf16>, vector<32x64xbf16>, vector<8x64xf32> -> vector<8x64xf32>
    %c0_5 = arith.constant 0 : index
    %c0_6 = arith.constant 0 : index
    %7 = vector.load %arg9[%c0_5, %c0_6] : memref<1x64xf32, #tpu.memory_space<vmem>>, vector<1x64xf32>
    %8 = vector.broadcast %7 : vector<1x64xf32> to vector<8x64xf32>
    %9 = arith.addf %6, %8 : vector<8x64xf32>
    %10 = arith.truncf %9 : vector<8x64xf32> to vector<8x64xbf16>
    %11 = vector.extract_strided_slice %10 {offsets = [0, 0], sizes = [8, 16], strides = [1, 1]} : vector<8x64xbf16> to vector<8x16xbf16>
    %c0_7 = arith.constant 0 : index
    %c0_8 = arith.constant 0 : index
    %12 = vector.load %arg14[%c0_7, %c0_8] : memref<16x64xbf16, #tpu.memory_space<vmem>>, vector<16x16xbf16>
    %c0_9 = arith.constant 0 : index
    %c0_10 = arith.constant 0 : index
    %13 = vector.load %arg15[%c0_9, %c0_10] : memref<8x32xbf16, #tpu.memory_space<vmem>>, vector<8x8xbf16>
    %cst_11 = arith.constant dense<0.000000e+00> : vector<8x16xf32>
    %14 = tpu.matmul %11, %12, %cst_11 {dimension_numbers = #tpu.dot_dimension_numbers<[1], [1], [0], [0], [0, 0, 1, 0], [], []>} : vector<8x16xbf16>, vector<16x16xbf16>, vector<8x16xf32> -> vector<8x16xf32>
    %15 = vector.extract_strided_slice %14 {offsets = [0, 0], sizes = [8, 8], strides = [1, 1]} : vector<8x16xf32> to vector<8x8xf32>
    %16 = vector.extract_strided_slice %14 {offsets = [0, 8], sizes = [8, 8], strides = [1, 1]} : vector<8x16xf32> to vector<8x8xf32>
    %17 = arith.mulf %15, %15 : vector<8x8xf32>
    %18 = arith.mulf %16, %16 : vector<8x8xf32>
    %19 = arith.addf %17, %18 : vector<8x8xf32>
    %20 = math.sqrt %19 : vector<8x8xf32>
    %cst_12 = arith.constant dense<0xFF800000> : vector<8xf32>
    %21 = vector.multi_reduction <maximumf>, %20, %cst_12 [1] : vector<8x8xf32> to vector<8xf32>
    %22 = vector.shape_cast %21 : vector<8xf32> to vector<8x1xf32>
    %23 = vector.broadcast %22 : vector<8x1xf32> to vector<8x8xf32>
    %24 = arith.subf %20, %23 : vector<8x8xf32>
    %25 = math.exp %24 : vector<8x8xf32>
    %cst_13 = arith.constant dense<0.000000e+00> : vector<8xf32>
    %26 = vector.multi_reduction <add>, %25, %cst_13 [1] : vector<8x8xf32> to vector<8xf32>
    %27 = vector.shape_cast %26 : vector<8xf32> to vector<8x1xf32>
    %28 = arith.truncf %25 : vector<8x8xf32> to vector<8x8xbf16>
    %cst_14 = arith.constant dense<0.000000e+00> : vector<8x8xf32>
    %29 = tpu.matmul %28, %13, %cst_14 {dimension_numbers = #tpu.dot_dimension_numbers<[1], [0], [0], [1], [0, 0, 1, 1], [], []>} : vector<8x8xbf16>, vector<8x8xbf16>, vector<8x8xf32> -> vector<8x8xf32>
    %30 = tpu.reciprocal %27 {approx = true} : vector<8x1xf32> -> vector<8x1xf32>
    %31 = vector.broadcast %30 : vector<8x1xf32> to vector<8x8xf32>
    %32 = arith.mulf %29, %31 : vector<8x8xf32>
    %33 = arith.truncf %32 : vector<8x8xf32> to vector<8x8xbf16>
    %c0_15 = arith.constant 0 : index
    %c0_16 = arith.constant 0 : index
    %34 = vector.load %arg16[%c0_15, %c0_16] : memref<8x32xbf16, #tpu.memory_space<vmem>>, vector<8x8xbf16>
    tpu.vector_store %arg16[%c0_15, %c0_16], %33 {strides = array<i32>} : memref<8x32xbf16, #tpu.memory_space<vmem>>, vector<8x8xbf16>,
    %35 = vector.extract_strided_slice %10 {offsets = [0, 16], sizes = [8, 16], strides = [1, 1]} : vector<8x64xbf16> to vector<8x16xbf16>
    %c0_17 = arith.constant 0 : index
    %c16 = arith.constant 16 : index
    %36 = vector.load %arg14[%c0_17, %c16] : memref<16x64xbf16, #tpu.memory_space<vmem>>, vector<16x16xbf16>
    %c0_18 = arith.constant 0 : index
    %c8 = arith.constant 8 : index
    %37 = vector.load %arg15[%c0_18, %c8] : memref<8x32xbf16, #tpu.memory_space<vmem>>, vector<8x8xbf16>
    %cst_19 = arith.constant dense<0.000000e+00> : vector<8x16xf32>
    %38 = tpu.matmul %35, %36, %cst_19 {dimension_numbers = #tpu.dot_dimension_numbers<[1], [1], [0], [0], [0, 0, 1, 0], [], []>} : vector<8x16xbf16>, vector<16x16xbf16>, vector<8x16xf32> -> vector<8x16xf32>
    %39 = vector.extract_strided_slice %38 {offsets = [0, 0], sizes = [8, 8], strides = [1, 1]} : vector<8x16xf32> to vector<8x8xf32>
    %40 = vector.extract_strided_slice %38 {offsets = [0, 8], sizes = [8, 8], strides = [1, 1]} : vector<8x16xf32> to vector<8x8xf32>
    %41 = arith.mulf %39, %39 : vector<8x8xf32>
    %42 = arith.mulf %40, %40 : vector<8x8xf32>
    %43 = arith.addf %41, %42 : vector<8x8xf32>
    %44 = math.sqrt %43 : vector<8x8xf32>
    %cst_20 = arith.constant dense<0xFF800000> : vector<8xf32>
    %45 = vector.multi_reduction <maximumf>, %44, %cst_20 [1] : vector<8x8xf32> to vector<8xf32>
    %46 = vector.shape_cast %45 : vector<8xf32> to vector<8x1xf32>
    %47 = vector.broadcast %46 : vector<8x1xf32> to vector<8x8xf32>
    %48 = arith.subf %44, %47 : vector<8x8xf32>
    %49 = math.exp %48 : vector<8x8xf32>
    %cst_21 = arith.constant dense<0.000000e+00> : vector<8xf32>
    %50 = vector.multi_reduction <add>, %49, %cst_21 [1] : vector<8x8xf32> to vector<8xf32>
    %51 = vector.shape_cast %50 : vector<8xf32> to vector<8x1xf32>
    %52 = arith.truncf %49 : vector<8x8xf32> to vector<8x8xbf16>
    %cst_22 = arith.constant dense<0.000000e+00> : vector<8x8xf32>
    %53 = tpu.matmul %52, %37, %cst_22 {dimension_numbers = #tpu.dot_dimension_numbers<[1], [0], [0], [1], [0, 0, 1, 1], [], []>} : vector<8x8xbf16>, vector<8x8xbf16>, vector<8x8xf32> -> vector<8x8xf32>
    %54 = tpu.reciprocal %51 {approx = true} : vector<8x1xf32> -> vector<8x1xf32>
    %55 = vector.broadcast %54 : vector<8x1xf32> to vector<8x8xf32>
    %56 = arith.mulf %53, %55 : vector<8x8xf32>
    %57 = arith.truncf %56 : vector<8x8xf32> to vector<8x8xbf16>
    %c0_23 = arith.constant 0 : index
    %c8_24 = arith.constant 8 : index
    %58 = vector.load %arg16[%c0_23, %c8_24] : memref<8x32xbf16, #tpu.memory_space<vmem>>, vector<8x8xbf16>
    tpu.vector_store %arg16[%c0_23, %c8_24], %57 {strides = array<i32>} : memref<8x32xbf16, #tpu.memory_space<vmem>>, vector<8x8xbf16>,
    %59 = vector.extract_strided_slice %10 {offsets = [0, 32], sizes = [8, 16], strides = [1, 1]} : vector<8x64xbf16> to vector<8x16xbf16>
    %c0_25 = arith.constant 0 : index
    %c32 = arith.constant 32 : index
    %60 = vector.load %arg14[%c0_25, %c32] : memref<16x64xbf16, #tpu.memory_space<vmem>>, vector<16x16xbf16>
    %c0_26 = arith.constant 0 : index
    %c16_27 = arith.constant 16 : index
    %61 = vector.load %arg15[%c0_26, %c16_27] : memref<8x32xbf16, #tpu.memory_space<vmem>>, vector<8x8xbf16>
    %cst_28 = arith.constant dense<0.000000e+00> : vector<8x16xf32>
    %62 = tpu.matmul %59, %60, %cst_28 {dimension_numbers = #tpu.dot_dimension_numbers<[1], [1], [0], [0], [0, 0, 1, 0], [], []>} : vector<8x16xbf16>, vector<16x16xbf16>, vector<8x16xf32> -> vector<8x16xf32>
    %63 = vector.extract_strided_slice %62 {offsets = [0, 0], sizes = [8, 8], strides = [1, 1]} : vector<8x16xf32> to vector<8x8xf32>
    %64 = vector.extract_strided_slice %62 {offsets = [0, 8], sizes = [8, 8], strides = [1, 1]} : vector<8x16xf32> to vector<8x8xf32>
    %65 = arith.mulf %63, %63 : vector<8x8xf32>
    %66 = arith.mulf %64, %64 : vector<8x8xf32>
    %67 = arith.addf %65, %66 : vector<8x8xf32>
    %68 = math.sqrt %67 : vector<8x8xf32>
    %cst_29 = arith.constant dense<0xFF800000> : vector<8xf32>
    %69 = vector.multi_reduction <maximumf>, %68, %cst_29 [1] : vector<8x8xf32> to vector<8xf32>
    %70 = vector.shape_cast %69 : vector<8xf32> to vector<8x1xf32>
    %71 = vector.broadcast %70 : vector<8x1xf32> to vector<8x8xf32>
    %72 = arith.subf %68, %71 : vector<8x8xf32>
    %73 = math.exp %72 : vector<8x8xf32>
    %cst_30 = arith.constant dense<0.000000e+00> : vector<8xf32>
    %74 = vector.multi_reduction <add>, %73, %cst_30 [1] : vector<8x8xf32> to vector<8xf32>
    %75 = vector.shape_cast %74 : vector<8xf32> to vector<8x1xf32>
    %76 = arith.truncf %73 : vector<8x8xf32> to vector<8x8xbf16>
    %cst_31 = arith.constant dense<0.000000e+00> : vector<8x8xf32>
    %77 = tpu.matmul %76, %61, %cst_31 {dimension_numbers = #tpu.dot_dimension_numbers<[1], [0], [0], [1], [0, 0, 1, 1], [], []>} : vector<8x8xbf16>, vector<8x8xbf16>, vector<8x8xf32> -> vector<8x8xf32>
    %78 = tpu.reciprocal %75 {approx = true} : vector<8x1xf32> -> vector<8x1xf32>
    %79 = vector.broadcast %78 : vector<8x1xf32> to vector<8x8xf32>
    %80 = arith.mulf %77, %79 : vector<8x8xf32>
    %81 = arith.truncf %80 : vector<8x8xf32> to vector<8x8xbf16>
    %c0_32 = arith.constant 0 : index
    %c16_33 = arith.constant 16 : index
    %82 = vector.load %arg16[%c0_32, %c16_33] : memref<8x32xbf16, #tpu.memory_space<vmem>>, vector<8x8xbf16>
    tpu.vector_store %arg16[%c0_32, %c16_33], %81 {strides = array<i32>} : memref<8x32xbf16, #tpu.memory_space<vmem>>, vector<8x8xbf16>,
    %83 = vector.extract_strided_slice %10 {offsets = [0, 48], sizes = [8, 16], strides = [1, 1]} : vector<8x64xbf16> to vector<8x16xbf16>
    %c0_34 = arith.constant 0 : index
    %c48 = arith.constant 48 : index
    %84 = vector.load %arg14[%c0_34, %c48] : memref<16x64xbf16, #tpu.memory_space<vmem>>, vector<16x16xbf16>
    %c0_35 = arith.constant 0 : index
    %c24 = arith.constant 24 : index
    %85 = vector.load %arg15[%c0_35, %c24] : memref<8x32xbf16, #tpu.memory_space<vmem>>, vector<8x8xbf16>
    %cst_36 = arith.constant dense<0.000000e+00> : vector<8x16xf32>
    %86 = tpu.matmul %83, %84, %cst_36 {dimension_numbers = #tpu.dot_dimension_numbers<[1], [1], [0], [0], [0, 0, 1, 0], [], []>} : vector<8x16xbf16>, vector<16x16xbf16>, vector<8x16xf32> -> vector<8x16xf32>
    %87 = vector.extract_strided_slice %86 {offsets = [0, 0], sizes = [8, 8], strides = [1, 1]} : vector<8x16xf32> to vector<8x8xf32>
    %88 = vector.extract_strided_slice %86 {offsets = [0, 8], sizes = [8, 8], strides = [1, 1]} : vector<8x16xf32> to vector<8x8xf32>
    %89 = arith.mulf %87, %87 : vector<8x8xf32>
    %90 = arith.mulf %88, %88 : vector<8x8xf32>
    %91 = arith.addf %89, %90 : vector<8x8xf32>
    %92 = math.sqrt %91 : vector<8x8xf32>
    %cst_37 = arith.constant dense<0xFF800000> : vector<8xf32>
    %93 = vector.multi_reduction <maximumf>, %92, %cst_37 [1] : vector<8x8xf32> to vector<8xf32>
    %94 = vector.shape_cast %93 : vector<8xf32> to vector<8x1xf32>
    %95 = vector.broadcast %94 : vector<8x1xf32> to vector<8x8xf32>
    %96 = arith.subf %92, %95 : vector<8x8xf32>
    %97 = math.exp %96 : vector<8x8xf32>
    %cst_38 = arith.constant dense<0.000000e+00> : vector<8xf32>
    %98 = vector.multi_reduction <add>, %97, %cst_38 [1] : vector<8x8xf32> to vector<8xf32>
    %99 = vector.shape_cast %98 : vector<8xf32> to vector<8x1xf32>
    %100 = arith.truncf %97 : vector<8x8xf32> to vector<8x8xbf16>
    %cst_39 = arith.constant dense<0.000000e+00> : vector<8x8xf32>
    %101 = tpu.matmul %100, %85, %cst_39 {dimension_numbers = #tpu.dot_dimension_numbers<[1], [0], [0], [1], [0, 0, 1, 1], [], []>} : vector<8x8xbf16>, vector<8x8xbf16>, vector<8x8xf32> -> vector<8x8xf32>
    %102 = tpu.reciprocal %99 {approx = true} : vector<8x1xf32> -> vector<8x1xf32>
    %103 = vector.broadcast %102 : vector<8x1xf32> to vector<8x8xf32>
    %104 = arith.mulf %101, %103 : vector<8x8xf32>
    %105 = arith.truncf %104 : vector<8x8xf32> to vector<8x8xbf16>
    %c0_40 = arith.constant 0 : index
    %c24_41 = arith.constant 24 : index
    %106 = vector.load %arg16[%c0_40, %c24_41] : memref<8x32xbf16, #tpu.memory_space<vmem>>, vector<8x8xbf16>
    tpu.vector_store %arg16[%c0_40, %c24_41], %105 {strides = array<i32>} : memref<8x32xbf16, #tpu.memory_space<vmem>>, vector<8x8xbf16>,
    %c0_42 = arith.constant 0 : index
    %c0_43 = arith.constant 0 : index
    %107 = vector.load %arg16[%c0_42, %c0_43] : memref<8x32xbf16, #tpu.memory_space<vmem>>, vector<8x32xbf16>
    %c0_44 = arith.constant 0 : index
    %c0_45 = arith.constant 0 : index
    %108 = vector.load %arg8[%c0_44, %c0_45] : memref<32x32xbf16, #tpu.memory_space<vmem>>, vector<32x32xbf16>
    %cst_46 = arith.constant dense<0.000000e+00> : vector<8x32xf32>
    %109 = tpu.matmul %107, %108, %cst_46 {dimension_numbers = #tpu.dot_dimension_numbers<[1], [0], [0], [1], [0, 0, 1, 1], [], []>} : vector<8x32xbf16>, vector<32x32xbf16>, vector<8x32xf32> -> vector<8x32xf32>
    %c0_47 = arith.constant 0 : index
    %c0_48 = arith.constant 0 : index
    %110 = vector.load %arg12[%c0_47, %c0_48] : memref<1x32xf32, #tpu.memory_space<vmem>>, vector<1x32xf32>
    %111 = vector.broadcast %110 : vector<1x32xf32> to vector<8x32xf32>
    %112 = arith.addf %109, %111 : vector<8x32xf32>
    %c0_49 = arith.constant 0 : index
    %c0_50 = arith.constant 0 : index
    %c0_51 = arith.constant 0 : index
    %113 = vector.load %arg13[%c0_49, %c0_50, %c0_51] : memref<1x8x32xf32, #tpu.memory_space<vmem>>, vector<1x8x32xf32>
    %114 = vector.shape_cast %113 : vector<1x8x32xf32> to vector<8x32xf32>
    %115 = vector.shape_cast %112 : vector<8x32xf32> to vector<1x8x32xf32>
    tpu.vector_store %arg13[%c0_49, %c0_50, %c0_51], %115 {strides = array<i32>} : memref<1x8x32xf32, #tpu.memory_space<vmem>>, vector<1x8x32xf32>,
    return
  }
  func.func @transform_0(%arg0: i32, %arg1: i32) -> (i32, i32, i32) {
    %c0_i32 = arith.constant 0 : i32
    %c0_i32_0 = arith.constant 0 : i32
    return %arg0, %arg1, %c0_i32 : i32, i32, i32
  }
  func.func @transform_1(%arg0: i32, %arg1: i32) -> (i32, i32, i32) {
    %c0_i32 = arith.constant 0 : i32
    %c0_i32_0 = arith.constant 0 : i32
    %c0_i32_1 = arith.constant 0 : i32
    return %arg0, %c0_i32, %c0_i32_0 : i32, i32, i32
  }
  func.func @transform_2(%arg0: i32, %arg1: i32) -> (i32, i32, i32) {
    %c0_i32 = arith.constant 0 : i32
    %c0_i32_0 = arith.constant 0 : i32
    %c0_i32_1 = arith.constant 0 : i32
    return %arg0, %c0_i32, %c0_i32_0 : i32, i32, i32
  }
  func.func @transform_3(%arg0: i32, %arg1: i32) -> (i32, i32) {
    %c0_i32 = arith.constant 0 : i32
    %c0_i32_0 = arith.constant 0 : i32
    %c0_i32_1 = arith.constant 0 : i32
    return %c0_i32, %c0_i32_0 : i32, i32
  }
  func.func @transform_4(%arg0: i32, %arg1: i32) -> (i32, i32) {
    %c0_i32 = arith.constant 0 : i32
    %c0_i32_0 = arith.constant 0 : i32
    %c0_i32_1 = arith.constant 0 : i32
    return %c0_i32, %c0_i32_0 : i32, i32
  }
  func.func @transform_5(%arg0: i32, %arg1: i32) -> (i32, i32) {
    %c0_i32 = arith.constant 0 : i32
    %c0_i32_0 = arith.constant 0 : i32
    %c0_i32_1 = arith.constant 0 : i32
    return %c0_i32, %c0_i32_0 : i32, i32
  }
  func.func @transform_6(%arg0: i32, %arg1: i32) -> (i32, i32) {
    %c0_i32 = arith.constant 0 : i32
    %c0_i32_0 = arith.constant 0 : i32
    %c0_i32_1 = arith.constant 0 : i32
    return %c0_i32, %c0_i32_0 : i32, i32
  }
  func.func @transform_7(%arg0: i32, %arg1: i32) -> (i32, i32) {
    %c0_i32 = arith.constant 0 : i32
    %c0_i32_0 = arith.constant 0 : i32
    %c0_i32_1 = arith.constant 0 : i32
    return %c0_i32, %c0_i32_0 : i32, i32
  }
  func.func @transform_8(%arg0: i32, %arg1: i32) -> (i32, i32) {
    %c0_i32 = arith.constant 0 : i32
    %c0_i32_0 = arith.constant 0 : i32
    %c0_i32_1 = arith.constant 0 : i32
    return %c0_i32, %c0_i32_0 : i32, i32
  }
  func.func @transform_9(%arg0: i32, %arg1: i32) -> (i32, i32) {
    %c0_i32 = arith.constant 0 : i32
    %c0_i32_0 = arith.constant 0 : i32
    %c0_i32_1 = arith.constant 0 : i32
    return %c0_i32, %c0_i32_0 : i32, i32
  }
  func.func @transform_10(%arg0: i32, %arg1: i32) -> (i32, i32) {
    %c0_i32 = arith.constant 0 : i32
    %c0_i32_0 = arith.constant 0 : i32
    %c0_i32_1 = arith.constant 0 : i32
    return %c0_i32, %c0_i32_0 : i32, i32
  }
  func.func @transform_11(%arg0: i32, %arg1: i32) -> (i32, i32, i32) {
    %c0_i32 = arith.constant 0 : i32
    %c0_i32_0 = arith.constant 0 : i32
    return %arg0, %arg1, %c0_i32 : i32, i32, i32
  }
}

</mosaic_0001>

<bundles_post_ra>
// kernel: tpu_custom_call.1
= control target key start
LH: loop header
LB: loop body
LE: loop exit
PB: predicated region body
PF: predicated region fallthrough
CT: control target
= control target key end

     0   :  { %s2637_s0 = inlined_call_operand.hbm [shape: bf16[2,8,32], index: 0, kind: input, shape index: {}]   ;;  %s2638_s1 = inlined_call_operand.hbm [shape: bf16[2,8,32], index: 1, kind: input, shape index: {}]   ;;  %s2639_s2 = inlined_call_operand.hbm [shape: bf16[2,8,32], index: 2, kind: input, shape index: {}]   ;;  %s2640_s3 = inlined_call_operand.hbm [shape: bf16[32,64], index: 3, kind: input, shape index: {}]   ;;  %s2641_s4 = inlined_call_operand.hbm [shape: bf16[32,128], index: 4, kind: input, shape index: {}]   ;;  %s2642_s5 = inlined_call_operand.vmem [shape: bf16[32,32], index: 5, kind: input, shape index: {}]   ;;  %s2643_s6 = inlined_call_operand.hbm [shape: bf16[32,32], index: 6, kind: input, shape index: {}]   ;;  %s2644_s7 = inlined_call_operand.vmem [shape: f32[1,64], index: 7, kind: input, shape index: {}]   ;;  %s2645_s8 = inlined_call_operand.vmem [shape: f32[1,128], index: 8, kind: input, shape index: {}]   ;;  %s2646_s9 = inlined_call_operand.vmem [shape: f32[1,32], index: 9, kind: input, shape index: {}]   ;;  %s2647_s10 = inlined_call_operand.vmem [shape: f32[1,32], index: 10, kind: input, shape index: {}]   ;;  %s2648_s11 = inlined_call_operand.hbm [shape: f32[2,8,32], index: 11, kind: output, shape index: {}]  }
   0x1   :  { %2675 = sst [smem:[#allocation30_spill]] %s2638_s1 }
   0x2   :  { %2676 = sst [smem:[#allocation31_spill]] %s2640_s3 }
   0x3   :  { %2677 = sst [smem:[#allocation32_spill]] %s2644_s7 }
   0x4   :  { %2678 = sst [smem:[#allocation33_spill]] %s2645_s8 }
   0x5   :  { %2679 = sst [smem:[#allocation34_spill]] %s2646_s9 }
   0x6   :  { %2680 = sst [smem:[#allocation35_spill]] %s2647_s10 }
   0x7   :  { %2681 = sst [smem:[#allocation36_spill]] %s2648_s11 }
   0x8   :  { %16 = vsyncpa [#allocation6], 0 }
   0x9   :  { %18 = vsyncpa [#allocation6 + $0x1], 0 }
   0xa   :  { %19 = vsyncpa [#allocation9], 0 }
   0xb   :  { %21 = vsyncpa [#allocation9 + $0x1], 0 }
   0xc   :  { %22 = vsyncpa [#allocation12], 0 }
   0xd   :  { %23 = vsyncpa [#allocation15], 0 }
   0xe   :  { %24 = vsyncpa [#allocation7], 0 }
   0xf   :  { %26 = vsyncpa [#allocation7 + $0x1], 0  ;;  %s2198_s17 = smov 0   ;;  %s2200_s18 = smov 0  }
  0x10   :  { %s2202_s19 = smov 0   ;;  %s2204_s20 = smov 0  }
  0x11   :  { %s2206_s21 = smov 0   ;;  %s2208_s22 = smov 0  }
  0x12 LB: > { %2682 = sst [smem:[#allocation22_spill]] %s2096_s17  ;;  %s2229_s23 = sadd.s32 4294967295, %s2116_s22   ;;  %s2116_s22 = sphi %s2208_s22, %s32_s22   ;;  %s2112_s21 = sphi %s2206_s21, %s2730_s21   ;;  %s2108_s20 = sphi %s2204_s20, %s2729_s20   ;;  %s2104_s19 = sphi %s2202_s19, %s2733_s19   ;;  %s2100_s18 = sphi %s2200_s18, %s2732_s18   ;;  %s2096_s17 = sphi %s2198_s17, %s2731_s17  }
  0x13   : > { %2683 = sst [smem:[#allocation23_spill]] %s2108_s20  ;;  %s1532_s24 = sadd.s32 4294967294, %s2116_s22  }
  0x14   : > { %2684 = sst [smem:[#allocation24_spill]] %s2112_s21  ;;  %p66_p0 = scmp.ne.s32.totalorder %s2100_s18, %s2096_s17 }
  0x15   : > { %2685 = sst [smem:[#allocation25_spill]] %s2116_s22  ;;  %p2651_p1 = scmp.eq.s32.totalorder %s2229_s23, 0 }
  0x16   : > { %p318_p3 = scmp.eq.s32.totalorder %s1532_s24, 1  ;;  %p1533_p5 = scmp.ge.s32.totalorder %s2116_s22, 1 }
  0x17   : > { %p2238_p4 = por %p2651_p1, %p66_p0  ;;  %p325_p7 = scmp.lt.s32.totalorder %s2116_s22, 3 }
  0x18   : > { %p2243_p6 = por %p318_p3, %p66_p0  ;;  %s2118_s28 = smov [#allocation11]  }
  0x19   : > { %s2686_s25 = scalar_select %p2238_p4, 1, 0 }
  0x1a   : > { %s2687_s26 = scalar_select %p2243_p6, 1, 0 }
  0x1b   : > { %p2248_p8 = pnand %p1533_p5, %p325_p7  ;;  %s337_s29 = sshll.u32 %s2118_s28, 4  ;;  %s338_s29 = int_to_ptr.vmem [resolvable:$true] %s337_s29 }
  0x1c   : > { %2688 = sst [smem:[#allocation26_spill]] %s2687_s26  ;;  %s44_s12 = sadd.s32 1, %s2112_s21 }
  0x1d   : > { %s2689_s27 = scalar_select %p2248_p8, 1, 0 }
  0x1e   : > { %p1717_p9 = pneg %p2248_p8  ;;  %s2691_s3 = sld [smem:[#allocation31_spill]] }
  0x20   : > { %p2257_p11 = pnand %p1717_p9, %p2651_p1 }
  0x22   : > { %s2690_s30 = scalar_select %p2257_p11, 1, 0 }
  0x23   : > { %p2270_p13 = pneg %p2257_p11 }
  0x24   : > { %s1848_s15 = scalar_lea.hbm %s2691_s3, 256 }
  0x25   : > { %p1849_p12 = scmp.ne.s32.totalorder %s2691_s3, %s1848_s15  ;;  %p1855_p5 = scmp.lt.u32.totalorder %s1848_s15, %s2691_s3 }
  0x26   : > { %s2692_s28 = scalar_select %p2270_p13, 1, 0 }
  0x27   : > { %p1851_p0 = pnand %p2270_p13, %p1849_p12 }
  0x29   : > { %p1852_p3 = pneg %p1851_p0 }
  0x2b   : > { %p1857_p7 = pnand %p1855_p5, %p1852_p3 }
  0x2d   : > { %1860 = shalt.err (!%p1857_p7)
}
  0x2e   : > { %s1861_s13 = scalar_lea.vmem %s338_s29, 256  ;;  %p1869_p2 = scmp.lt.s32.totalorder %s338_s29, %s338_s29 }
  0x2f   : > { %p1862_p9 = scmp.ne.s32.totalorder %s338_s29, %s1861_s13  ;;  %p1870_p6 = scmp.lt.s32.totalorder %s1861_s13, %s1861_s13 }
  0x31   : > { %p1864_p10 = pnand %p1862_p9, %p2270_p13  ;;  %p1871_p4 = por %p1870_p6, %p1869_p2 }
  0x33   : > { %p1865_p1 = pneg %p1864_p10 }
  0x35   : > { %p1872_p8 = pnand %p1871_p4, %p1865_p1 }
  0x37   : > { %1875 = shalt.err (!%p1872_p8)
}
  0x38   : > { %s2655_s14 = smov 64   ;;  %s2657_s17 = smov 4  }
  0x39   : > { %1720 = dma.hbm_to_vmem [thread:$0]  (!%p2257_p11), %s2691_s3, 256, %s338_s29, [#allocation12], %s2655_s14, %s2655_s14, %s2657_s17  }
  0x3a   : > { %p46_p1 = scmp.ge.s32.totalorder %s44_s12, 2  ;;  %s53_s16 = sadd.s32 1, %s2104_s19 }
  0x3b   : > { %p60_p2 = scmp.ne.s32.totalorder %s2104_s19, %s2100_s18  ;;  %p61_p4 = scmp.eq.s32.totalorder %s2116_s22, 0 }
  0x3c   : > { %s2735_s12 = smov (%p46_p1, %s44_s12), 0  ;;  %p2694_p8 = scmp.eq.s32.totalorder %s2229_s23, 1 }
  0x3d   : > { %2693 = sst [smem:[#allocation27_spill]] %s2735_s12  ;;  %p62_p6 = por %p61_p4, %p60_p2 }
  0x3e   : > { %p2297_p10 = por %p2694_p8, %p60_p2  ;;  %s48_s13 = ssub.s32 %s2112_s21, %s2735_s12 }
  0x3f   : > { %p1744_p12 = scmp.lt.s32.totalorder %s2116_s22, 2  ;;  %p51_p0 = scmp.eq.s32.totalorder %s48_s13, 0 }
  0x40   : > { %s2695_s24 = scalar_select %p2297_p10, 1, 0 }
  0x41   : > { %s2660_s11 = sand.u32 1, %s2104_s19   ;;  %s2310_s26 = sshll.u32 %s2112_s21, 6 }
  0x42   : > { %2696 = sst [smem:[#allocation28_spill]] %s2695_s24  ;;  %s2307_s29 = sshll.u32 %s2660_s11, 2 }
  0x43   : > { %s2313_s15 = scalar_select %p51_p0, %s2104_s19, %s53_s16  }
  0x44   : > { %p2315_p3 = pnand %p1744_p12, %p62_p6  ;;  %s411_s17 = sand.u32 1, %s2116_s22  }
  0x45   : > { %2697 = sst [smem:[#allocation29_spill]] %s2313_s15  ;;  %s2699_s1 = sld [smem:[#allocation30_spill]] }
  0x46   : > { %s2698_s14 = scalar_select %p2315_p3, 1, 0 }
  0x47   : > { %s415_s11 = scalar_lea.vmem [#allocation8], %s2307_s29  ;;  %s2121_s16 = smov [#allocation13]  }
  0x48   : > { %s422_s21 = sshll.u32 %s415_s11, 4  ;;  %s2329_s15 = sshll.u32 %s2121_s16, 4  ;;  %s2327_s21 = int_to_ptr.vmem [resolvable:$true] %s422_s21  ;;  %s351_s15 = int_to_ptr.vmem [resolvable:$true] %s2329_s15 }
  0x49   : > { %s2331_s24 = scalar_lea.sflag [#allocation9], %s411_s17  ;;  %p2337_p7 = pneg %p2315_p3 }
  0x4b   : > { %s2324_s13 = scalar_lea.hbm %s2699_s1, %s2310_s26  ;;  %s1881_s22 = scalar_lea.hbm %s2699_s1, 128 }
  0x4c   : > { %s1876_s10 = scalar_lea.hbm %s2324_s13, 64  ;;  %p1882_p2 = scmp.lt.u32.totalorder %s2324_s13, %s2699_s1 }
  0x4d   : > { %p1877_p5 = scmp.ne.s32.totalorder %s2324_s13, %s1876_s10  ;;  %p1883_p4 = scmp.lt.u32.totalorder %s1881_s22, %s1876_s10 }
  0x4e   : > { %s2700_s3 = scalar_select %p2337_p7, 1, 0 }
  0x4f   : > { %p1879_p9 = pnand %p2337_p7, %p1877_p5  ;;  %p1884_p6 = por %p1883_p4, %p1882_p2 }
  0x50   : > { %p1885_p8 = scmp.lt.u32.totalorder %s1876_s10, %s2324_s13 }
  0x51   : > { %p1880_p1 = pneg %p1879_p9 }
  0x52   : > { %p1886_p12 = por %p1885_p8, %p1884_p6 }
  0x54   : > { %p1887_p0 = pnand %p1886_p12, %p1880_p1 }
  0x56   : > { %1890 = shalt.err (!%p1887_p0)
}
  0x57   : > { %s1891_s17 = scalar_lea.vmem %s2327_s21, 64  ;;  %s2122_s12 = smov [#allocation8]  }
  0x58   : > { %p1892_p5 = scmp.ne.s32.totalorder %s2327_s21, %s1891_s17  ;;  %s1896_s11 = sshll.u32 %s2122_s12, 4  ;;  %s1897_s11 = int_to_ptr.vmem [resolvable:$false] %s1896_s11 }
  0x59   : > { %s1898_s20 = scalar_lea.vmem %s1897_s11, 128  ;;  %p1899_p11 = scmp.lt.s32.totalorder %s2327_s21, %s1897_s11 }
  0x5a   : > { %p1894_p9 = pnand %p1892_p5, %p2337_p7  ;;  %p1900_p13 = scmp.lt.s32.totalorder %s1898_s20, %s1891_s17 }
  0x5c   : > { %p1895_p10 = pneg %p1894_p9  ;;  %p1901_p2 = por %p1900_p13, %p1899_p11 }
  0x5e   : > { %p1902_p4 = pnand %p1901_p2, %p1895_p10 }
  0x60   : > { %1905 = shalt.err (!%p1902_p4)
}
  0x61   : > { %1733 = dma.hbm_to_vmem [thread:$0]  (!%p2315_p3), %s2324_s13, 64, %s2327_s21, %s2331_s24  }
  0x62   : > { %s1906_s16 = scalar_lea.hbm %s2641_s4, 256  ;;  %p2701_p11 = scmp.ne.s32.totalorder %s2692_s28, 0 }
  0x63   : > { %p1907_p1 = scmp.ne.s32.totalorder %s2641_s4, %s1906_s16  ;;  %p1913_p6 = scmp.lt.u32.totalorder %s1906_s16, %s2641_s4 }
  0x65   : > { %p1909_p13 = pnand %p1907_p1, %p2701_p11 }
  0x67   : > { %p1910_p10 = pneg %p1909_p13 }
  0x69   : > { %p1915_p8 = pnand %p1913_p6, %p1910_p10 }
  0x6b   : > { %1918 = shalt.err (!%p1915_p8)
}
  0x6c   : > { %s1919_s20 = scalar_lea.vmem %s351_s15, 256  ;;  %p1927_p9 = scmp.lt.s32.totalorder %s351_s15, %s351_s15 }
  0x6d   : > { %p1920_p12 = scmp.ne.s32.totalorder %s351_s15, %s1919_s20  ;;  %p1928_p2 = scmp.lt.s32.totalorder %s1919_s20, %s1919_s20 }
  0x6f   : > { %p1922_p0 = pnand %p1920_p12, %p2701_p11  ;;  %p1929_p4 = por %p1928_p2, %p1927_p9 }
  0x71   : > { %p1923_p5 = pneg %p1922_p0 }
  0x73   : > { %p1930_p3 = pnand %p1929_p4, %p1923_p5 }
  0x75   : > { %1933 = shalt.err (!%p1930_p3)
}
  0x76   : > { %p2702_p1 = scmp.ne.s32.totalorder %s2690_s30, 0  ;;  %s2703_s1 = smov 4  }
  0x77   : > { %s2704_s21 = smov 64   ;;  %s2123_s22 = smov [#allocation14]  }
  0x78   : > { %1723 = dma.hbm_to_vmem [thread:$0]  (!%p2702_p1), %s2641_s4, 256, %s351_s15, [#allocation12], %s2704_s21, %s2704_s21, %s2703_s1  }
  0x79   : > { %s366_s16 = sshll.u32 %s2123_s22, 4  ;;  %s1934_s11 = scalar_lea.hbm %s2643_s6, 256  ;;  %s367_s16 = int_to_ptr.vmem [resolvable:$true] %s366_s16 }
  0x7a   : > { %p1935_p3 = scmp.ne.s32.totalorder %s2643_s6, %s1934_s11  ;;  %p1941_p6 = scmp.lt.u32.totalorder %s1934_s11, %s2643_s6 }
  0x7c   : > { %p1937_p13 = pnand %p1935_p3, %p2701_p11 }
  0x7e   : > { %p1938_p10 = pneg %p1937_p13 }
  0x80   : > { %p1943_p8 = pnand %p1941_p6, %p1938_p10 }
  0x82   : > { %1946 = shalt.err (!%p1943_p8)
}
  0x83   : > { %s1947_s15 = scalar_lea.vmem %s367_s16, 256  ;;  %p1955_p9 = scmp.lt.s32.totalorder %s367_s16, %s367_s16 }
  0x84   : > { %p1948_p12 = scmp.ne.s32.totalorder %s367_s16, %s1947_s15  ;;  %p1956_p2 = scmp.lt.s32.totalorder %s1947_s15, %s1947_s15 }
  0x86   : > { %p1950_p0 = pnand %p1948_p12, %p2701_p11  ;;  %p1957_p4 = por %p1956_p2, %p1955_p9 }
  0x88   : > { %p1951_p5 = pneg %p1950_p0 }
  0x8a   : > { %p1958_p7 = pnand %p1957_p4, %p1951_p5 }
  0x8c   : > { %1961 = shalt.err (!%p1958_p7)
}
  0x8d   : > { %1726 = dma.hbm_to_vmem [thread:$0]  (!%p2702_p1), %s2643_s6, 256, %s367_s16, [#allocation15], %s2704_s21, %s2704_s21, %s2703_s1  }
  0x8e   : > { %s2408_s13 = scalar_lea.hbm %s2637_s0, %s2310_s26  ;;  %s396_s30 = scalar_lea.vmem [#allocation5], %s2307_s29 }
  0x8f   : > { %s404_s10 = sshll.u32 %s396_s30, 4  ;;  %s2705_s22 = sand.u32 1, %s2104_s19   ;;  %s405_s10 = int_to_ptr.vmem [resolvable:$true] %s404_s10 }
  0x90   : > { %s393_s12 = scalar_lea.sflag [#allocation6], %s2705_s22  ;;  %s1962_s17 = scalar_lea.hbm %s2408_s13, 64 }
  0x91   : > { %p1963_p7 = scmp.ne.s32.totalorder %s2408_s13, %s1962_s17  ;;  %p2706_p11 = scmp.ne.s32.totalorder %s2700_s3, 0 }
  0x92   : > { %s1967_s16 = scalar_lea.hbm %s2637_s0, 128  ;;  %p1968_p1 = scmp.lt.u32.totalorder %s2408_s13, %s2637_s0 }
  0x93   : > { %p1965_p3 = pnand %p1963_p7, %p2706_p11  ;;  %p1969_p10 = scmp.lt.u32.totalorder %s1967_s16, %s1962_s17 }
  0x94   : > { %p1971_p8 = scmp.lt.u32.totalorder %s1962_s17, %s2408_s13 }
  0x95   : > { %p1966_p13 = pneg %p1965_p3  ;;  %p1970_p6 = por %p1969_p10, %p1968_p1 }
  0x97   : > { %p1972_p12 = por %p1971_p8, %p1970_p6 }
  0x99   : > { %p1973_p0 = pnand %p1972_p12, %p1966_p13 }
  0x9b   : > { %1976 = shalt.err (!%p1973_p0)
}
  0x9c   : > { %s1977_s15 = scalar_lea.vmem %s405_s10, 64  ;;  %s2124_s7 = smov [#allocation5]  }
  0x9d   : > { %p1978_p5 = scmp.ne.s32.totalorder %s405_s10, %s1977_s15  ;;  %s1982_s8 = sshll.u32 %s2124_s7, 4  ;;  %s1983_s8 = int_to_ptr.vmem [resolvable:$false] %s1982_s8 }
  0x9e   : > { %s1984_s9 = scalar_lea.vmem %s1983_s8, 128  ;;  %p1985_p4 = scmp.lt.s32.totalorder %s405_s10, %s1983_s8 }
  0x9f   : > { %p1980_p9 = pnand %p1978_p5, %p2706_p11  ;;  %p1986_p7 = scmp.lt.s32.totalorder %s1984_s9, %s1977_s15 }
  0xa1   : > { %p1981_p2 = pneg %p1980_p9  ;;  %p1987_p3 = por %p1986_p7, %p1985_p4 }
  0xa3   : > { %p1988_p1 = pnand %p1987_p3, %p1981_p2 }
  0xa5   : > { %1991 = shalt.err (!%p1988_p1)
}
  0xa6   : > { %p2707_p10 = scmp.ne.s32.totalorder %s2698_s14, 0  ;;  %s2434_s22 = scalar_lea.hbm %s2639_s2, %s2310_s26 }
  0xa7   : > { %s433_s17 = scalar_lea.vmem [#allocation10], %s2307_s29  ;;  %s1992_s21 = scalar_lea.hbm %s2434_s22, 64 }
  0xa8   : > { %1730 = dma.hbm_to_vmem [thread:$0]  (!%p2707_p10), %s2408_s13, 64, %s405_s10, %s393_s12  }
  0xa9   : > { %s440_s1 = sshll.u32 %s433_s17, 4  ;;  %p1993_p13 = scmp.ne.s32.totalorder %s2434_s22, %s1992_s21  ;;  %s441_s1 = int_to_ptr.vmem [resolvable:$true] %s440_s1 }
  0xaa   : > { %s1997_s13 = scalar_lea.hbm %s2639_s2, 128  ;;  %p1998_p12 = scmp.lt.u32.totalorder %s2434_s22, %s2639_s2 }
  0xab   : > { %p1995_p6 = pnand %p1993_p13, %p2706_p11  ;;  %p1999_p0 = scmp.lt.u32.totalorder %s1997_s13, %s1992_s21 }
  0xac   : > { %p2001_p9 = scmp.lt.u32.totalorder %s1992_s21, %s2434_s22 }
  0xad   : > { %p1996_p8 = pneg %p1995_p6  ;;  %p2000_p5 = por %p1999_p0, %p1998_p12 }
  0xaf   : > { %p2002_p2 = por %p2001_p9, %p2000_p5 }
  0xb1   : > { %p2003_p4 = pnand %p2002_p2, %p1996_p8 }
  0xb3   : > { %2006 = shalt.err (!%p2003_p4)
}
  0xb4   : > { %s2007_s29 = scalar_lea.vmem %s441_s1, 64  ;;  %s2125_s26 = smov [#allocation10]  }
  0xb5   : > { %p2008_p7 = scmp.ne.s32.totalorder %s441_s1, %s2007_s29  ;;  %s2012_s20 = sshll.u32 %s2125_s26, 4  ;;  %s2013_s20 = int_to_ptr.vmem [resolvable:$false] %s2012_s20 }
  0xb6   : > { %s2014_s15 = scalar_lea.vmem %s2013_s20, 128  ;;  %p2015_p13 = scmp.lt.s32.totalorder %s441_s1, %s2013_s20 }
  0xb7   : > { %p2010_p3 = pnand %p2008_p7, %p2706_p11  ;;  %p2016_p6 = scmp.lt.s32.totalorder %s2014_s15, %s2007_s29 }
  0xb9   : > { %p2011_p1 = pneg %p2010_p3  ;;  %p2017_p10 = por %p2016_p6, %p2015_p13 }
  0xbb   : > { %p2018_p0 = pnand %p2017_p10, %p2011_p1 }
  0xbd   : > { %2021 = shalt.err (!%p2018_p0)
}
  0xbe   : > { %p2708_p12 = scmp.ne.s32.totalorder %s2698_s14, 0  ;;  %p2709_p8 = scmp.ne.s32.totalorder %s2689_s27, 0 }
  0xbf   : > { %s2458_s3 = sand.u32 (!%p2709_p8), 1, %s2100_s18   ;;  %p2710_p11 = scmp.ne.s32.totalorder (!%p2709_p8), %s2686_s25, 0 }
  0xc0   : > { %1736 = dma.hbm_to_vmem [thread:$0]  (!%p2708_p12), %s2434_s22, 64, %s441_s1, %s2331_s24  }
  0xc1   : > { %449 = sbr.rel (%p2709_p8) target bundleno = 1774 (0x6ee), region = 64  ;;  %s2461_s7 = sshll.u32 (!%p2709_p8), %s2458_s3, 2 }
  0xc2   : > { %s452_s8 = scalar_lea.sflag (!%p2709_p8), [#allocation6], %s2458_s3  ;;  %s455_s9 = scalar_lea.vmem (!%p2709_p8), [#allocation5], %s2461_s7 }
  0xc8   : > { %2075 = dma.done.wait (%p2710_p11), %s452_s8, 64  }
  0xc9   : > { %2077 = vsyncadd (%p2710_p11), %s452_s8, 4294967232  ;;  %s460_s27 = sand.u32 1, %s2229_s23   ;;  %s464_s24 = scalar_lea.vmem [#allocation8], %s2461_s7 }
  0xca   : > { %s461_s14 = scalar_lea.sflag [#allocation9], %s460_s27 }
  0xcb   : > { %2079 = dma.done.wait (%p2710_p11), %s461_s14, 128  }
  0xcc   : > { %2081 = vsyncadd (%p2710_p11), %s461_s14, 4294967168  ;;  %s473_s28 = scalar_lea.vmem [#allocation10], %s2461_s7  ;;  %p2711_p10 = scmp.eq.s32.totalorder %s2229_s23, 0 }
  0xce   : > { %2083 = dma.done.wait (%p2711_p10), [#allocation12], 512   ;;  %p2712_p5 = pmov %p2711_p10 }
  0xd0   : > { %2085 = vsyncadd (%p2712_p5), [#allocation12], 4294966784  ;;  %p2713_p9 = pmov %p2712_p5 }
  0xd1   : > { %p2714_p2 = pmov %p2712_p5 }
  0xd2   : > { %2087 = dma.done.wait (%p2713_p9), [#allocation15], 256  }
  0xd3   : > { %2089 = vsyncadd (%p2714_p2), [#allocation15], 4294967040  ;;  %v2126_v0 = vmov 0.0   ;;  %vm2127_vm0 = vmmov 0   ;;  %v1813_v1 = vld [vmem:[#allocation13] sm:$0xff]   ;;  %v1814_v2 = vld [vmem:[#allocation13 + $0x8] sm:$0xff]  }
  0xd4   : > { %1617 = vmatprep.subr.bf16.mxu0 %v2126_v0  ;;  %1621 = vmatprep.mubr.msk.bf16.mxu0 %vm2127_vm0, %v2126_v0  ;;  %v539_v3 = vld [vmem:[%s464_s24] sm:$0xf]  ;;  %vm564_vm1 = vcmask 261120   ;;  %v1815_v4 = vld [vmem:[#allocation11] sm:$0xff]   ;;  %v1816_v5 = vld [vmem:[#allocation11 + $0x8] sm:$0xff]   ;;  %s2715_s21 = sld [smem:[#allocation33_spill]] }
  0xd5   : > { %1625 = vmatprep.subr.bf16.mxu1 %v2126_v0  ;;  %1629 = vmatprep.mubr.msk.bf16.mxu1 %vm2127_vm0, %v2126_v0  ;;  %v687_v6 = vld [vmem:[%s455_s9] sm:$0xf]  ;;  %v1818_v8 = vld [vmem:[%s2642_s5 + $0x8] sm:$0xff]   ;;  %v540_v9 = vld [vmem:[%s473_s28] sm:$0xf]  ;;  %vm609_vm2 = vcmask 519168  }
  0xd6   : > { %1618 = vmatpush3.bf16.msra.mxu0 %v1813_v1  ;;  %v1817_v7 = vld [vmem:[%s2642_s5] sm:$0xff]   ;;  %s2716_s13 = sld [smem:[#allocation32_spill]]  ;;  %s2128_s10 = smov 64   ;;  %vm616_vm3 = vcmask 523268   ;;  %vm758_vm4 = vcmask 130048   ;;  %vm685_vm5 = vcmask 257024  }
  0xd7   : > { %1619 = vmatprep.subr.bf16.mxu0 %v2126_v0  ;;  %1626 = vmatpush3.bf16.msra.mxu1 %v1817_v7  ;;  %s2129_s12 = smov 112   ;;  %s2130_s29 = smov 96   ;;  %vm832_vm6 = vcmask 1043456   ;;  %vm818_vm9 = vcmask 64512  }
  0xd8   : > { %1627 = vmatprep.subr.bf16.mxu1 %v2126_v0  ;;  %s2131_s26 = smov 80   ;;  %s2717_s7 = sld [smem:[#allocation34_spill]] }
  0xd9   : > { %s2132_s8 = smov 120   ;;  %s2133_s9 = smov 104  }
  0xda   : > { %1620 = vmatpush3.bf16.msra.mxu0 %v1814_v2  ;;  %v1552_v10 = vld [vmem:[%s2715_s21] ss:$0 sm:$0xff]  ;;  %s2134_s27 = smov 8   ;;  %s2135_s14 = smov 16  }
  0xdb   : > { %1633 = vmatprep.subr.bf16.mxu0 %v2126_v0  ;;  %1628 = vmatpush3.bf16.msra.mxu1 %v1818_v8  ;;  %s2718_s24 = sld [smem:[#allocation23_spill]]  ;;  %s2136_s28 = smov 24  }
  0xdc   : > { %1641 = vmatprep.subr.bf16.mxu1 %v2126_v0  ;;  %v1560_v18 = vld [vmem:[%s2716_s13] ss:$0 sm:$0xff]  ;;  %s1551_s23 = sshll.u32 %s2458_s3, 3  ;;  %s2719_s22 = sld [smem:[#allocation35_spill]] }
  0xdd   : > { %1622 = vmatmul.mubr.msk.bf16.vlgmr.msra.gmra.mrb[0].mxu0 %vm564_vm1, %v539_v3  ;;  %s2720_s17 = sld [smem:[#allocation28_spill]]  ;;  %s533_s21 = scalar_lea.vmem [#allocation16], %s1551_s23 }
  0xde   : > { %1634 = vmatpush3.bf16.msra.mxu0 %v1815_v4  ;;  %1637 = vmatprep.mubr.msk.bf16.mxu0 %vm2127_vm0, %v2126_v0  ;;  %v1556_v28 = vld [vmem:[%s2717_s7] ss:$0 sm:$0xff]  ;;  %s1379_s16 = sshll.u32 %s533_s21, 4  ;;  %s2137_s20 = smov [#allocation16]   ;;  %s2589_s16 = int_to_ptr.vmem [resolvable:$true] %s1379_s16 }
  0xdf   : > { %1635 = vmatprep.subr.bf16.mxu0 %v2126_v0  ;;  %1630 = vmatmul.mubr.msk.bf16.vlgmr.msra.gmra.mrb[0].mxu1 %vm564_vm1, %v540_v9  ;;  %s2026_s15 = sshll.u32 %s2137_s20, 4  ;;  %s2027_s15 = int_to_ptr.vmem [resolvable:$false] %s2026_s15 }
  0xe0   : > { %1643 = vmatprep.mubr.msk.bf16.mxu1 %vm2127_vm0, %v2126_v0  ;;  %s2028_s7 = scalar_lea.vmem %s2027_s15, 256  ;;  %p2029_p13 = scmp.lt.s32.totalorder %s2589_s16, %s2027_s15 }
  0xe1   : > { %s1583_s1 = sshll.u32 %s2718_s24, 7 }
  0xe2   : > { %1636 = vmatpush3.bf16.msra.mxu0 %v1816_v5 }
  0xe3   : > { %1647 = vmatprep.subr.bf16.mxu0 %v2126_v0  ;;  %p2722_p7 = scmp.ne.s32.totalorder %s2720_s17, 0 }
  0xe5   : > { %1638 = vmatmul.mubr.msk.bf16.vlgmr.msra.gmra.mrb[4].mxu0 %vm564_vm1, %v687_v6 }
  0xe6   : > { %1649 = vmatprep.mubr.msk.bf16.mxu0 %vm2127_vm0, %v2126_v0 }
 0x1b0   : > { %v602_v11 = vpop.f32.mrb[0].mxu0 }
 0x1b1   : > { %v603_v12 = vadd.f32 %v1552_v10, %v602_v11  ;;  %v1623_v13 = vpop.f32.mrb[1].mxu0 }
 0x1b2   : > { %v605_v14 = vpop.f32.mrb[2].mxu0  ;;  %v678_v29 = vpop.f32.mrb[0].mxu1 }
 0x1b3   : > { %v608_v15 = vpack.c.bf16 %v603_v12, %v603_v12  ;;  %v1624_v16 = vpop.f32.mrb[3].mxu0  ;;  %v679_v30 = vadd.f32 %v1556_v28, %v678_v29  ;;  %v1631_v31 = vpop.f32.mrb[1].mxu1 }
 0x1b4   : > { %v681_v32 = vpop.f32.mrb[2].mxu1 }
 0x1b5   : > { %610 = vst.msk [vmem:[#allocation2] sm:$0xf] %vm609_vm2, %v608_v15  ;;  %v612_v17 = vrot.slane %v608_v15, 4  ;;  %v684_v33 = vpack.c.bf16 %v679_v30, %v679_v30  ;;  %v1632_v34 = vpop.f32.mrb[3].mxu1  ;;  %vm1018_vm2 = vcmask 126016  }
 0x1b7   : > { %613 = vrot.lane.b32.xlu0 %v612_v17, %s2128_s10  ;;  %686 = vst.msk [vmem:[#allocation3] sm:$0xf] %vm685_vm5, %v684_v33  ;;  %s2721_s10 = sld [smem:[#allocation36_spill]] }
 0x1b8   : > { %v749_v19 = vpop.f32.mrb[4].mxu0 }
 0x1b9   : > { %v750_v20 = vadd.f32 %v1560_v18, %v749_v19  ;;  %v1639_v21 = vpop.f32.mrb[5].mxu0 }
 0x1ba   : > { %v752_v22 = vpop.f32.mrb[6].mxu0 }
 0x1bb   : > { %v755_v23 = vpack.c.bf16 %v750_v20, %v750_v20  ;;  %v1640_v24 = vpop.f32.mrb[7].mxu0 }
 0x1bd   : > { %884 = vrot.lane.b32.xlu1 %v755_v23, %s2129_s12 }
 0x1be   : > { %v757_v35 = vld [vmem:[#allocation3] sm:$0xf] }
 0x1bf   : > { %v834_v36 = vsel %vm832_vm6, %v757_v35, 0  ;;  %v1819_v11 = vld [vmem:[#allocation3] ss:$0 sps:$4 sm:$0xff]  }
 0x1c0   : > { %1648 = vmatpush3.bf16.msra.mxu0 %v834_v36  ;;  %v1820_v36 = vld [vmem:[#allocation3] ss:$0 sps:$4 sm:$0xff]  }
 0x1c1   : > { %1659 = vmatprep.subr.bf16.mxu0 %v2126_v0 }
 0x229   : > { %v614_v25 = vpop.permute.xlu0 %613 }
 0x22a   : > { %617 = vst.msk [vmem:[#allocation2] sm:$0xf0] %vm616_vm3, %v614_v25  ;;  %vm1156_vm3 = vcmask 191616  }
 0x22f   : > { %v885_v37 = vpop.permute.xlu1 %884 }
 0x231   : > { %v881_v26 = vld [vmem:[#allocation2] sm:$0xff] }
 0x232   : > { %887 = vrot.lane.b32.xlu0 %v881_v26, %s2129_s12  ;;  %1025 = vrot.lane.b32.xlu1 %v881_v26, %s2130_s29  ;;  %v763_v27 = vsel %vm758_vm4, %v881_v26, 0 }
 0x233   : > { %1642 = vmatpush3.bf16.xpose.msra.mxu1 %v763_v27 }
 0x234   : > { %1653 = vmatprep.subr.bf16.mxu1 %v2126_v0 }
 0x236   : > { %1022 = vrot.lane.b32.xlu0 %v755_v23, %s2130_s29  ;;  %1163 = vrot.lane.b32.xlu1 %v881_v26, %s2131_s26  ;;  %s1365_s29 = scalar_lea.sflag [#allocation7], %s2458_s3 }
 0x23a   : > { %1160 = vrot.lane.b32.xlu0 %v755_v23, %s2131_s26  ;;  %1644 = vmatmul.mubr.msk.bf16.vlgmr.msra.gmra.mrb[4].mxu1 %vm758_vm4, %v755_v23  ;;  %s2022_s26 = scalar_lea.vmem %s2589_s16, 128 }
 0x23b   : > { %1655 = vmatprep.mubr.msk.bf16.mxu1 %vm2127_vm0, %v2126_v0  ;;  %p2023_p4 = scmp.ne.s32.totalorder %s2589_s16, %s2022_s26  ;;  %p2030_p6 = scmp.lt.s32.totalorder %s2028_s7, %s2022_s26 }
 0x23d   : > { %p2024_p3 = pnand %p2023_p4, %p2722_p7  ;;  %p2031_p0 = por %p2030_p6, %p2029_p13 }
 0x23f   : > { %p2025_p1 = pneg %p2024_p3 }
 0x241   : > { %p2032_p12 = pnand %p2031_p0, %p2025_p1 }
 0x2a4   : > { %v888_v38 = vpop.permute.xlu0 %887  ;;  %v1026_v40 = vpop.permute.xlu1 %1025 }
 0x2a5   : > { %v893_v39 = vsel %vm758_vm4, %v888_v38, 0  ;;  %v1031_v41 = vsel %vm758_vm4, %v1026_v40, 0 }
 0x2a6   : > { %1654 = vmatpush3.bf16.xpose.msra.mxu1 %v893_v39 }
 0x2a7   : > { %1665 = vmatprep.subr.bf16.mxu1 %v2126_v0 }
 0x2a8   : > { %v1164_v42 = vpop.permute.xlu1 %1163  ;;  %v1023_v43 = vpop.permute.xlu0 %1022 }
 0x2a9   : > { %v1169_v44 = vsel %vm758_vm4, %v1164_v42, 0 }
 0x2ac   : > { %v1161_v45 = vpop.permute.xlu0 %1160 }
 0x2ad   : > { %1656 = vmatmul.mubr.msk.bf16.vlgmr.msra.gmra.mrb[8].mxu1 %vm758_vm4, %v885_v37  ;;  %v1821_v37 = vld [vmem:[#allocation3] ss:$0 sps:$4 sm:$0xff]  }
 0x2ae   : > { %1666 = vmatpush3.bf16.xpose.msra.mxu1 %v1031_v41  ;;  %1667 = vmatprep.mubr.msk.bf16.mxu1 %vm2127_vm0, %v2126_v0 }
 0x2af   : > { %1677 = vmatprep.subr.bf16.mxu1 %v2126_v0 }
 0x2b5   : > { %1668 = vmatmul.mubr.msk.bf16.vlgmr.msra.gmra.mrb[12].mxu1 %vm758_vm4, %v1023_v43 }
 0x2b6   : > { %1678 = vmatpush3.bf16.xpose.msra.mxu1 %v1169_v44  ;;  %1679 = vmatprep.mubr.msk.bf16.mxu1 %vm2127_vm0, %v2126_v0 }
 0x2b7   : > { %1689 = vmatprep.subr.bf16.mxu1 %v2126_v0 }
 0x2bd   : > { %1680 = vmatmul.mubr.msk.bf16.vlgmr.msra.gmra.mrb[16].mxu1 %vm758_vm4, %v1161_v45  ;;  %vm1294_vm4 = vcmask 257216  }
 0x2be   : > { %1693 = vmatprep.mubr.msk.bf16.mxu1 %vm2127_vm0, %v2126_v0 }
 0x30d   : > { %v799_v46 = vpop.f32.mrb[4].mxu1 }
 0x30e   : > { %v805_v47 = vmul.f32 %v799_v46, %v799_v46  ;;  %v1645_v48 = vpop.f32.mrb[5].mxu1 }
 0x30f   : > { %v802_v49 = vpop.f32.mrb[6].mxu1 }
 0x310   : > { %807 = vrot.lane.b32.xlu1 %v805_v47, %s2132_s8  ;;  %v1646_v50 = vpop.f32.mrb[7].mxu1 }
 0x380   : > { %v929_v51 = vpop.f32.mrb[8].mxu1 }
 0x381   : > { %v935_v52 = vmul.f32 %v929_v51, %v929_v51  ;;  %v1657_v53 = vpop.f32.mrb[9].mxu1 }
 0x382   : > { %v932_v54 = vpop.f32.mrb[10].mxu1  ;;  %v808_v61 = vpop.permute.xlu1 %807 }
 0x383   : > { %937 = vrot.lane.b32.xlu0 %v935_v52, %s2132_s8  ;;  %v1658_v55 = vpop.f32.mrb[11].mxu1  ;;  %v810_v3 = vadd.f32 %v808_v61, %v805_v47 }
 0x385   : > { %1824 = vrsqrt.f32 %v810_v3  ;;  %vm813_vm7 = vcmp.eq.f32.partialorder %v810_v3, inf  ;;  %v816_v8 = vand.u32 2147483648, %v810_v3  ;;  %vm815_vm8 = vcmp.eq.f32.partialorder %v810_v3, 0.0 }
 0x388   : > { %v1067_v56 = vpop.f32.mrb[12].mxu1 }
 0x389   : > { %v1073_v57 = vmul.f32 %v1067_v56, %v1067_v56  ;;  %v1669_v58 = vpop.f32.mrb[13].mxu1 }
 0x38a   : > { %v1070_v59 = vpop.f32.mrb[14].mxu1 }
 0x38b   : > { %1075 = vrot.lane.b32.xlu1 %v1073_v57, %s2132_s8  ;;  %v1670_v60 = vpop.f32.mrb[15].mxu1 }
 0x38f   : > { %v1825_v5 = vpop.eup %1824 }
 0x390   : > { %v1205_v62 = vpop.f32.mrb[16].mxu1  ;;  %v812_v6 = vmul.f32 %v1825_v5, %v810_v3 }
 0x391   : > { %v1211_v63 = vmul.f32 %v1205_v62, %v1205_v62  ;;  %v1681_v1 = vpop.f32.mrb[17].mxu1 }
 0x392   : > { %v1208_v2 = vpop.f32.mrb[18].mxu1  ;;  %v814_v7 = vsel %vm813_vm7, %v810_v3, %v812_v6 }
 0x393   : > { %1213 = vrot.lane.b32.xlu0 %v1211_v63, %s2132_s8  ;;  %v1682_v4 = vpop.f32.mrb[19].mxu1  ;;  %v817_v9 = vsel %vm815_vm8, %v816_v8, %v814_v7 }
 0x394   : > { %v819_v10 = vsel %vm818_vm9, %v817_v9, -inf }
 0x3af   : > { %820 = vmax.xlane.f32.xlu1 %v819_v10 }
 0x3c0   : > { %1099 = vrot.lane.b32.xlu1 %v1819_v11, %s2129_s12  ;;  %s2587_s12 = scalar_lea.hbm %s2721_s10, %s1583_s1 }
 0x3f5   : > { %v938_v12 = vpop.permute.xlu0 %937 }
 0x3f6   : > { %v940_v13 = vadd.f32 %v938_v12, %v935_v52 }
 0x3f8   : > { %1826 = vrsqrt.f32 %v940_v13  ;;  %vm943_vm10 = vcmp.eq.f32.partialorder %v940_v13, inf  ;;  %v946_v18 = vand.u32 2147483648, %v940_v13  ;;  %vm945_vm11 = vcmp.eq.f32.partialorder %v940_v13, 0.0 }
 0x3fd   : > { %v1076_v14 = vpop.permute.xlu1 %1075 }
 0x3fe   : > { %v1078_v15 = vadd.f32 %v1076_v14, %v1073_v57 }
 0x400   : > { %1828 = vrsqrt.f32 %v1078_v15  ;;  %vm1081_vm12 = vcmp.eq.f32.partialorder %v1078_v15, inf  ;;  %v1084_v26 = vand.u32 2147483648, %v1078_v15  ;;  %vm1083_vm13 = vcmp.eq.f32.partialorder %v1078_v15, 0.0 }
 0x402   : > { %v1827_v16 = vpop.eup %1826 }
 0x403   : > { %v942_v17 = vmul.f32 %v1827_v16, %v940_v13 }
 0x405   : > { %v1214_v19 = vpop.permute.xlu0 %1213  ;;  %v944_v20 = vsel %vm943_vm10, %v940_v13, %v942_v17 }
 0x406   : > { %v1216_v21 = vadd.f32 %v1214_v19, %v1211_v63  ;;  %v947_v22 = vsel %vm945_vm11, %v946_v18, %v944_v20 }
 0x407   : > { %v948_v23 = vsel %vm818_vm9, %v947_v22, -inf }
 0x408   : > { %1830 = vrsqrt.f32 %v1216_v21  ;;  %949 = vmax.xlane.f32.xlu0 %v948_v23  ;;  %vm1219_vm14 = vcmp.eq.f32.partialorder %v1216_v21, inf  ;;  %v1222_v32 = vand.u32 2147483648, %v1216_v21  ;;  %vm1221_vm15 = vcmp.eq.f32.partialorder %v1216_v21, 0.0 }
 0x40a   : > { %v1829_v24 = vpop.eup %1828 }
 0x40b   : > { %v1080_v25 = vmul.f32 %v1829_v24, %v1078_v15 }
 0x40d   : > { %v1082_v27 = vsel %vm1081_vm12, %v1078_v15, %v1080_v25  ;;  %v1822_v25 = vld [vmem:[#allocation14] sm:$0xff]  }
 0x40e   : > { %v1085_v28 = vsel %vm1083_vm13, %v1084_v26, %v1082_v27  ;;  %1690 = vmatpush3.bf16.msra.mxu1 %v1822_v25 }
 0x40f   : > { %v1086_v29 = vsel %vm818_vm9, %v1085_v28, -inf  ;;  %1691 = vmatprep.subr.bf16.mxu1 %v2126_v0 }
 0x410   : > { %1087 = vmax.xlane.f32.xlu0 %v1086_v29  ;;  %v1823_v29 = vld [vmem:[#allocation14 + $0x8] sm:$0xff]  }
 0x412   : > { %v1831_v30 = vpop.eup %1830  ;;  %1692 = vmatpush3.bf16.msra.mxu1 %v1823_v29 }
 0x413   : > { %v1218_v31 = vmul.f32 %v1831_v30, %v1216_v21 }
 0x415   : > { %v1220_v33 = vsel %vm1219_vm14, %v1216_v21, %v1218_v31 }
 0x416   : > { %v1223_v34 = vsel %vm1221_vm15, %v1222_v32, %v1220_v33 }
 0x417   : > { %v1224_v35 = vsel %vm818_vm9, %v1223_v34, -inf }
 0x418   : > { %1225 = vmax.xlane.f32.xlu1 %v1224_v35 }
 0x426   : > { %961 = vrot.lane.b32.xlu0 %v1820_v36, %s2132_s8 }
 0x429   : > { %1237 = vrot.lane.b32.xlu1 %v1821_v37, %s2133_s9 }
 0x43c   : > { %v821_v38 = vpop.xlane.xlu1 %820 }
 0x43d   : > { %v822_v39 = vsub.f32 %v817_v9, %v821_v38 }
 0x43f   : > { %v823_v40 = vmul.f32 1.442695, %v822_v39 }
 0x440   : > { %v1100_v49 = vpop.permute.xlu1 %1099 }
 0x441   : > { %1832 = vpow2.f32 %v823_v40  ;;  %v1105_v57 = vsel %vm832_vm6, %v1100_v49, 0 }
 0x44b   : > { %v1833_v41 = vpop.eup %1832 }
 0x44c   : > { %v828_v42 = vpack.c.bf16 %v1833_v41, %v1833_v41  ;;  %v825_v4 = vsel %vm818_vm9, %v1833_v41, 0.0 }
 0x44e   : > { %1650 = vmatmul.mubr.msk.bf16.vlgmr.msra.gmra.mrb[8].mxu0 %vm818_vm9, %v828_v42  ;;  %v1578_v42 = vld [vmem:[%s2719_s22] ss:$0 sm:$0xff] }
 0x44f   : > { %1661 = vmatprep.mubr.msk.bf16.mxu0 %vm2127_vm0, %v2126_v0 }
 0x495   : > { %v950_v43 = vpop.xlane.xlu0 %949 }
 0x496   : > { %v951_v44 = vsub.f32 %v947_v22, %v950_v43 }
 0x498   : > { %v952_v45 = vmul.f32 1.442695, %v951_v44 }
 0x49a   : > { %1834 = vpow2.f32 %v952_v45 }
 0x49d   : > { %v1088_v46 = vpop.xlane.xlu0 %1087 }
 0x49e   : > { %v1089_v47 = vsub.f32 %v1085_v28, %v1088_v46 }
 0x4a0   : > { %v1090_v48 = vmul.f32 1.442695, %v1089_v47 }
 0x4a1   : > { %v962_v50 = vpop.permute.xlu0 %961 }
 0x4a2   : > { %1836 = vpow2.f32 %v1090_v48  ;;  %v967_v51 = vsel %vm832_vm6, %v962_v50, 0 }
 0x4a3   : > { %1660 = vmatpush3.bf16.msra.mxu0 %v967_v51 }
 0x4a4   : > { %v1835_v52 = vpop.eup %1834  ;;  %1671 = vmatprep.subr.bf16.mxu0 %v2126_v0 }
 0x4a5   : > { %v1226_v53 = vpop.xlane.xlu1 %1225  ;;  %v954_v54 = vsel %vm818_vm9, %v1835_v52, 0.0  ;;  %v957_v55 = vpack.c.bf16 %v1835_v52, %v1835_v52 }
 0x4a6   : > { %v1227_v56 = vsub.f32 %v1223_v34, %v1226_v53  ;;  %955 = vadd.xlane.f32.xlu0 %v954_v54 }
 0x4a7   : > { %1662 = vmatmul.mubr.msk.bf16.vlgmr.msra.gmra.mrb[12].mxu0 %vm818_vm9, %v957_v55 }
 0x4a8   : > { %v1228_v58 = vmul.f32 1.442695, %v1227_v56  ;;  %1672 = vmatpush3.bf16.msra.mxu0 %v1105_v57  ;;  %1673 = vmatprep.mubr.msk.bf16.mxu0 %vm2127_vm0, %v2126_v0 }
 0x4a9   : > { %1683 = vmatprep.subr.bf16.mxu0 %v2126_v0  ;;  %v1238_v60 = vpop.permute.xlu1 %1237 }
 0x4aa   : > { %1838 = vpow2.f32 %v1228_v58  ;;  %v1243_v63 = vsel %vm832_vm6, %v1238_v60, 0 }
 0x4ac   : > { %v1837_v59 = vpop.eup %1836 }
 0x4ad   : > { %v1092_v61 = vsel %vm818_vm9, %v1837_v59, 0.0  ;;  %v1095_v62 = vpack.c.bf16 %v1837_v59, %v1837_v59 }
 0x4ae   : > { %1093 = vadd.xlane.f32.xlu1 %v1092_v61 }
 0x4af   : > { %1674 = vmatmul.mubr.msk.bf16.vlgmr.msra.gmra.mrb[16].mxu0 %vm818_vm9, %v1095_v62 }
 0x4b0   : > { %1684 = vmatpush3.bf16.msra.mxu0 %v1243_v63  ;;  %1685 = vmatprep.mubr.msk.bf16.mxu0 %vm2127_vm0, %v2126_v0  ;;  %vm879_vm0 = vcmask 60416  }
 0x4b4   : > { %v1839_v1 = vpop.eup %1838 }
 0x4b5   : > { %v1230_v2 = vsel %vm818_vm9, %v1839_v1, 0.0  ;;  %v1233_v3 = vpack.c.bf16 %v1839_v1, %v1839_v1 }
 0x4b6   : > { %1231 = vadd.xlane.f32.xlu0 %v1230_v2 }
 0x4b7   : > { %1686 = vmatmul.mubr.msk.bf16.vlgmr.msra.gmra.mrb[20].mxu0 %vm818_vm9, %v1233_v3 }
 0x4ba   : > { %826 = vadd.xlane.f32.xlu0 %v825_v4 }
 0x521   : > { %v870_v5 = vpop.f32.mrb[8].mxu0 }
 0x522   : > { %v1651_v6 = vpop.f32.mrb[9].mxu0 }
 0x523   : > { %v873_v7 = vpop.f32.mrb[10].mxu0 }
 0x524   : > { %v1652_v8 = vpop.f32.mrb[11].mxu0 }
 0x533   : > { %v956_v9 = vpop.xlane.xlu0 %955 }
 0x53b   : > { %v1094_v15 = vpop.xlane.xlu1 %1093 }
 0x543   : > { %v1232_v10 = vpop.xlane.xlu0 %1231 }
 0x547   : > { %v827_v11 = vpop.xlane.xlu0 %826 }
 0x548   : > { %1840 = vrcp.f32 %v827_v11 }
 0x549   : > { %1842 = vrcp.f32 %v956_v9 }
 0x54a   : > { %1844 = vrcp.f32 %v1094_v15 }
 0x54b   : > { %1846 = vrcp.f32 %v1232_v10 }
 0x552   : > { %v1841_v12 = vpop.eup %1840 }
 0x553   : > { %v877_v13 = vmul.f32 %v1841_v12, %v870_v5  ;;  %v1843_v16 = vpop.eup %1842 }
 0x554   : > { %v1845_v23 = vpop.eup %1844 }
 0x555   : > { %v878_v14 = vpack.c.bf16 %v877_v13, %v877_v13  ;;  %v1847_v32 = vpop.eup %1846 }
 0x557   : > { %880 = vst.msk [vmem:[#allocation4] sm:$0xf] %vm879_vm0, %v878_v14 }
 0x57a   : > { %v1003_v17 = vpop.f32.mrb[12].mxu0 }
 0x57b   : > { %v1010_v18 = vmul.f32 %v1843_v16, %v1003_v17  ;;  %v1663_v19 = vpop.f32.mrb[13].mxu0 }
 0x57c   : > { %v1006_v20 = vpop.f32.mrb[14].mxu0 }
 0x57d   : > { %v1586_v21 = vpack.c.bf16 %v1010_v18, %v1010_v18  ;;  %v1664_v22 = vpop.f32.mrb[15].mxu0 }
 0x57f   : > { %1015 = vrot.lane.b32.xlu1 %v1586_v21, %s2134_s27 }
 0x582   : > { %v1141_v24 = vpop.f32.mrb[16].mxu0 }
 0x583   : > { %v1148_v26 = vmul.f32 %v1845_v23, %v1141_v24  ;;  %v1675_v27 = vpop.f32.mrb[17].mxu0 }
 0x584   : > { %v1144_v28 = vpop.f32.mrb[18].mxu0 }
 0x585   : > { %v1587_v30 = vpack.c.bf16 %v1148_v26, %v1148_v26  ;;  %v1676_v31 = vpop.f32.mrb[19].mxu0 }
 0x587   : > { %1153 = vrot.lane.b32.xlu0 %v1587_v30, %s2135_s14 }
 0x58a   : > { %v1279_v33 = vpop.f32.mrb[20].mxu0 }
 0x58b   : > { %v1286_v34 = vmul.f32 %v1847_v32, %v1279_v33  ;;  %v1687_v35 = vpop.f32.mrb[21].mxu0 }
 0x58c   : > { %v1282_v36 = vpop.f32.mrb[22].mxu0 }
 0x58d   : > { %v1588_v37 = vpack.c.bf16 %v1286_v34, %v1286_v34  ;;  %v1688_v38 = vpop.f32.mrb[23].mxu0 }
 0x58f   : > { %1291 = vrot.lane.b32.xlu1 %v1588_v37, %s2136_s28 }
 0x5f1   : > { %v1016_v39 = vpop.permute.xlu1 %1015 }
 0x5f2   : > { %1019 = vst.msk [vmem:[#allocation4] sm:$0xf] %vm1018_vm2, %v1016_v39 }
 0x5f9   : > { %v1154_v40 = vpop.permute.xlu0 %1153 }
 0x5fa   : > { %1157 = vst.msk [vmem:[#allocation4] sm:$0xf] %vm1156_vm3, %v1154_v40 }
 0x601   : > { %v1292_v0 = vpop.permute.xlu1 %1291 }
 0x602   : > { %1295 = vst.msk [vmem:[#allocation4] sm:$0xf] %vm1294_vm4, %v1292_v0 }
 0x609   : > { %v1296_v41 = vld [vmem:[#allocation4] sm:$0xf] }
 0x60a   : > { %1694 = vmatmul.mubr.msk.bf16.vlgmr.msra.gmra.mrb[20].mxu1 %vm564_vm1, %v1296_v41 }
 0x6dd   : > { %v1357_v43 = vpop.f32.mrb[20].mxu1 }
 0x6de   : > { %v1358_v44 = vadd.f32 %v1578_v42, %v1357_v43  ;;  %v1695_v45 = vpop.f32.mrb[21].mxu1 }
 0x6df   : > { %v1360_v46 = vpop.f32.mrb[22].mxu1 }
 0x6e0   : > { %v1696_v47 = vpop.f32.mrb[23].mxu1  ;;  %1363 = vst.msk [vmem:[%s533_s21] sm:$0xff] %vm564_vm1, %v1358_v44 }
 0x6e1   : > { %2035 = shalt.err (!%p2032_p12)
}
 0x6e2   : > { %s2036_s3 = scalar_lea.hbm %s2587_s12, 128  ;;  %s2040_s27 = scalar_lea.hbm %s2721_s10, 256 }
 0x6e3   : > { %p2037_p8 = scmp.ne.s32.totalorder %s2587_s12, %s2036_s3  ;;  %p2041_p5 = scmp.lt.u32.totalorder %s2587_s12, %s2721_s10 }
 0x6e4   : > { %p2042_p9 = scmp.lt.u32.totalorder %s2040_s27, %s2036_s3  ;;  %p2044_p4 = scmp.lt.u32.totalorder %s2036_s3, %s2587_s12 }
 0x6e5   : > { %p2038_p11 = pnand %p2037_p8, %p2722_p7 }
 0x6e6   : > { %p2043_p2 = por %p2042_p9, %p2041_p5 }
 0x6e7   : > { %p2039_p10 = pneg %p2038_p11 }
 0x6e8   : > { %p2045_p3 = por %p2044_p4, %p2043_p2 }
 0x6ea   : > { %p2046_p1 = pnand %p2045_p3, %p2039_p10 }
 0x6ec   : > { %2049 = shalt.err (!%p2046_p1)
}
 0x6ed   : > { %1715 = dma.vmem_to_hbm [thread:$0]  (%p2722_p7), %s2589_s16, 128, %s2587_s12, %s1365_s29  }
 0x6ee PF: > { %s2723_s28 = sld [smem:[#allocation22_spill]]  ;;  %s2724_s23 = sld [smem:[#allocation26_spill]] }
 0x6ef   : > { %s2725_s25 = sld [smem:[#allocation25_spill]] }
 0x6f4   : > { %s1391_s30 = sand.u32 1, %s2723_s28   ;;  %p2726_p13 = scmp.ne.s32.totalorder %s2724_s23, 0 }
 0x6f5   : > { %p2727_p6 = scmp.ge.s32.totalorder %s2725_s25, 2  ;;  %s1392_s22 = scalar_lea.sflag [#allocation7], %s1391_s30 }
 0x6f7   : > { %p1738_p0 = pnand %p2727_p6, %p2726_p13 }
 0x6f9   : > { %2091 = dma.done.wait (!%p1738_p0), %s1392_s22, 128  }
 0x6fa   : > { %2093 = vsyncadd (!%p1738_p0), %s1392_s22, 4294967168  ;;  %s32_s22 = sadd.s32 1, %s2725_s25   ;;  %s2728_s1 = sld [smem:[#allocation29_spill]] }
 0x6fb   : > { %p29_p12 = scmp.ge.s32.totalorder %s32_s22, 4   ;;  %s2729_s20 = sld [smem:[#allocation24_spill]] }
 0x6fc   : > { %s2730_s21 = sld [smem:[#allocation27_spill]]  ;;  %s2731_s17 = smov %s2100_s18 }
 0x6fd   : > { %s2732_s18 = smov %s2104_s19  ;;  %31 = sbr.rel (!%p29_p12) target bundleno = 18 (0x12), region = 149 }
 0x700   : > { %s2733_s19 = smov %s2728_s1 }
 0x704   :  { %1397 = vsyncpa [#allocation6], 1 }
 0x705   :  { %1399 = vsyncpa [#allocation6 + $0x1], 1 }
 0x706   :  { %1400 = vsyncpa [#allocation9], 1 }
 0x707   :  { %1402 = vsyncpa [#allocation9 + $0x1], 1 }
 0x708   :  { %1403 = vsyncpa [#allocation12], 1 }
 0x709   :  { %1404 = vsyncpa [#allocation15], 1 }
 0x70a   :  { %1405 = vsyncpa [#allocation7], 1 }
 0x70b   :  { %1407 = vsyncpa [#allocation7 + $0x1], 1 }

</bundles_post_ra>
